<compile_context>
chip_gen: v7x
topology: tpu7x:2x2x1
jax: 0.10.0
libtpu: 0.0.40
codegen_flags: <defaults>
</compile_context>

<pallas_src>
import functools

import jax
import jax.numpy as jnp
from jax.experimental import pallas as pl
from jax.experimental.pallas import tpu as pltpu


def _cross_attn_kernel(x_ref, z_ref, wk_ref, bk_ref, wv_ref, bv_ref,
                       wo_ref, bo_ref, o_ref, ctx_ref, *,
                       heads, head_ch, scale, mxu_dtype):
    # x_ref : (1, c, Tq)   query-token tile, channels-first (Tq on lanes)
    # z_ref : (1, c, L)    full key/value tokens, channels-first (resident across j)
    # wk_ref/wv_ref : (inner, c)    batched K/V projection weights (all heads)
    # bk_ref/bv_ref : (inner, 1)    batched K/V biases
    # wo_ref: (c, inner)            to_out weight (used directly, NT contraction)
    # bo_ref: (c, 1)                to_out bias
    # o_ref : (1, c, Tq)            residual output tile
    # ctx_ref: (Tq, inner) f32 VMEM scratch for the per-head contexts
    x = x_ref[0]                                     # (c, Tq)
    z = z_ref[0]                                     # (c, L)

    # Batched K/V projections of z (all heads at once), biases folded in once.
    k_all = jnp.dot(wk_ref[...].astype(mxu_dtype), z.astype(mxu_dtype),
                    preferred_element_type=jnp.float32) + bk_ref[...]   # (inner, L)
    v_all = jnp.dot(wv_ref[...].astype(mxu_dtype), z.astype(mxu_dtype),
                    preferred_element_type=jnp.float32) + bv_ref[...]   # (inner, L)

    # q shared across heads; pre-scaled so the (Tq, L) dots never needs an
    # elementwise scale. Single tiny transpose, hoisted out of the head loop.
    q = jnp.transpose(x * scale).astype(mxu_dtype)   # (Tq, c)

    nt = (((1,), (1,)), ((), ()))                    # contract last dims of both operands

    for hh in range(heads):                          # static unroll: heads is small
        k_h = k_all[hh * head_ch:(hh + 1) * head_ch, :]      # (head_ch, L)
        v_h = v_all[hh * head_ch:(hh + 1) * head_ch, :]      # (head_ch, L)

        # dots[l, m] = sum_ch q[l, ch] * k_h[ch, m]
        dots = jnp.dot(q, k_h.astype(mxu_dtype),
                       preferred_element_type=jnp.float32)   # (Tq, L)

        # Softmax over keys (lane axis); normalization deferred past P@V.
        m_max = jnp.max(dots, axis=-1, keepdims=True)        # (Tq, 1)
        p = jnp.exp(dots - m_max)                            # (Tq, L) f32
        denom = jnp.sum(p, axis=-1, keepdims=True)           # (Tq, 1)

        # out_h[l, ch] = sum_m p[l, m] * v_h[ch, m]   (NT dot_general, no transpose)
        out_h = jax.lax.dot_general(p.astype(mxu_dtype), v_h.astype(mxu_dtype),
                                    nt, preferred_element_type=jnp.float32)  # (Tq, head_ch)
        # Deferred softmax normalization + drop into the context buffer slot.
        ctx_ref[:, hh * head_ch:(hh + 1) * head_ch] = (
            out_h * pl.reciprocal(denom, approx=True))

    # to_out as ONE matmul with contraction over the full inner dim:
    # proj[ch, l] = sum_i w_out[ch, i] * ctx[l, i]
    proj = jax.lax.dot_general(wo_ref[...].astype(mxu_dtype),
                               ctx_ref[...].astype(mxu_dtype), nt,
                               preferred_element_type=jnp.float32)           # (c, Tq)

    # Residual + to_out bias. Dropout(p=0.0) is the identity.
    o_ref[0] = x + proj + bo_ref[...]


def _pick_tq(L, max_tq):
    """Largest 128-multiple divisor of L that is <= max_tq (falls back to L)."""
    if L % 128 != 0:
        # TODO(synk): non-128-multiple token counts produce masked lane stores;
        # pad h*w model-side for full lane density.
        return L
    tq = min(max_tq - (max_tq % 128), L) or L
    while L % tq != 0:
        tq -= 128
    return max(tq, 128)


def _vmem_limit_bytes(c, L, Tq, inner):
    """Generous scoped-VMEM estimate (double-buffered blocks + live intermediates)."""
    io_blocks = 2 * (2 * c * Tq) + 2 * (c * L)                   # x in + out, z
    weights = 2 * (2 * inner * c + 2 * inner + c * inner + c)
    interm = 2 * inner * L + 4 * Tq * L + 4 * Tq * inner + 4 * c * Tq
    est = (io_blocks + weights + interm) * 4
    return int(min(max(2 * est, 8 << 20), 64 << 20))


def cross_attn_block(x_nchw, z_nchw, params, *, heads, head_ch,
                     mxu_dtype=jnp.float32, max_tq=512):
    """Pallas implementation of CrossAttnBlock.forward(x, z) -> NCHW.

    max_tq: query-tile size cap. Keep Tq*L*4B*(few live copies) well inside VMEM
    (use a smaller max_tq on v7x / very large feature maps, larger on v5e/v6e).
    mxu_dtype: bf16 on v6e/v7x for cheaper MXU operands, f32 on v5e (no bf16 VPU/EUP).
    """
    b, c, h, w = x_nchw.shape
    L = h * w
    inner = heads * head_ch
    out_ch = params["w_out"].shape[0]
    # The module's einsum contracts x's channel axis against k's head-channel axis,
    # and its `.view(b, c, h, w)` after to_out needs to_out's output width == c.
    assert head_ch == c and out_ch == c, \
        "CrossAttnBlock only type-checks with head_channel == dim"
    scale = float(head_ch) ** -0.5

    Tq = _pick_tq(L, max_tq)
    n_q = L // Tq

    # Lane-dense token layout: channels on sublanes, L = h*w on lanes.
    # These are raw reshapes of NCHW (no transpose, no HBM shuffle).
    x_cl = x_nchw.reshape(b, c, L)
    z_cl = z_nchw.reshape(b, c, L)

    # Tiny weights, pre-arranged once so the kernel never transposes them.
    wk = params["w_k"].reshape(inner, c)
    bk = params["b_k"].reshape(inner, 1)
    wv = params["w_v"].reshape(inner, c)
    bv = params["b_v"].reshape(inner, 1)
    wo = params["w_out"].reshape(out_ch, inner)
    bo = params["b_out"].reshape(out_ch, 1)

    kernel = functools.partial(_cross_attn_kernel, heads=heads, head_ch=head_ch,
                               scale=scale, mxu_dtype=mxu_dtype)

    out_cl = pl.pallas_call(
        kernel,
        out_shape=jax.ShapeDtypeStruct((b, c, L), jnp.float32),
        grid_spec=pltpu.PrefetchScalarGridSpec(
            num_scalar_prefetch=0,
            grid=(b, n_q),
            in_specs=[
                pl.BlockSpec((1, c, Tq), lambda i, j: (i, 0, j)),        # x tile
                pl.BlockSpec((1, c, L), lambda i, j: (i, 0, 0)),         # z (resident)
                pl.BlockSpec((inner, c), lambda i, j: (0, 0)),           # wk
                pl.BlockSpec((inner, 1), lambda i, j: (0, 0)),           # bk
                pl.BlockSpec((inner, c), lambda i, j: (0, 0)),           # wv
                pl.BlockSpec((inner, 1), lambda i, j: (0, 0)),           # bv
                pl.BlockSpec((out_ch, inner), lambda i, j: (0, 0)),      # wo
                pl.BlockSpec((out_ch, 1), lambda i, j: (0, 0)),          # bo
            ],
            out_specs=pl.BlockSpec((1, c, Tq), lambda i, j: (i, 0, j)),
            scratch_shapes=[pltpu.VMEM((Tq, inner), jnp.float32)],       # per-head ctx
        ),
        compiler_params=pltpu.CompilerParams(
            dimension_semantics=("parallel", "parallel"),
            vmem_limit_bytes=_vmem_limit_bytes(c, L, Tq, inner)),
    )(x_cl, z_cl, wk, bk, wv, bv, wo, bo)

    # Free reshape back to NCHW (channels-first token layout == NCHW memory layout).
    return out_cl.reshape(b, c, h, w)


def _reference(x, z, params, *, heads, head_ch):
    """Pure-JAX reference of the intended CrossAttnBlock forward."""
    b, c, h, w = x.shape
    L = h * w
    inner = heads * head_ch
    hi = jax.lax.Precision.HIGHEST

    z_tok = jnp.transpose(z, (0, 2, 3, 1)).reshape(b, L, c)
    q_tok = jnp.transpose(x, (0, 2, 3, 1)).reshape(b, L, c)

    k = jnp.einsum('blc,ic->bli', z_tok, params["w_k"], precision=hi) + params["b_k"]
    v = jnp.einsum('blc,ic->bli', z_tok, params["w_v"], precision=hi) + params["b_v"]
    k = k.reshape(b, L, heads, head_ch).transpose(0, 2, 1, 3)   # b h m c
    v = v.reshape(b, L, heads, head_ch).transpose(0, 2, 1, 3)

    # q is broadcast across heads (module's unsqueeze(1)); requires head_ch == c.
    dots = jnp.einsum('blc,bhmc->bhlm', q_tok, k, precision=hi) * (head_ch ** -0.5)
    attn = jax.nn.softmax(dots, axis=-1)
    out = jnp.einsum('bhlm,bhmc->bhlc', attn, v, precision=hi)
    out = out.transpose(0, 2, 1, 3).reshape(b, L, inner)
    out = jnp.einsum('bli,oi->blo', out, params["w_out"], precision=hi) + params["b_out"]
    # Intended inverse rearrange of the module's `.view(b, c, h, w)` (see TODO above).
    out = jnp.transpose(out.reshape(b, h, w, c), (0, 3, 1, 2))
    return x + out


if __name__ == "__main__":
    # Module hyperparameters (CrossAttnBlock only type-checks with head_channel == dim).
    dim = 4
    heads = 2
    head_ch = dim
    inner = heads * head_ch
    b, c, h, w = 2, dim, 16, 16          # L = 256

    key = jax.random.PRNGKey(0)
    ks = jax.random.split(key, 8)
    params = {
        "w_k":   jax.random.normal(ks[0], (inner, dim), jnp.float32) * 0.1,
        "b_k":   jax.random.normal(ks[1], (inner,), jnp.float32) * 0.1,
        "w_v":   jax.random.normal(ks[2], (inner, dim), jnp.float32) * 0.1,
        "b_v":   jax.random.normal(ks[3], (inner,), jnp.float32) * 0.1,
        "w_out": jax.random.normal(ks[4], (head_ch, inner), jnp.float32) * 0.1,
        "b_out": jax.random.normal(ks[5], (head_ch,), jnp.float32) * 0.1,
    }
    x = jax.random.normal(ks[6], (b, c, h, w), jnp.float32)
    z = jax.random.normal(ks[7], (b, c, h, w), jnp.float32)

    # max_tq=128 so the test exercises the query-tile grid axis (grid = (2, 2)).
    fwd = jax.jit(functools.partial(cross_attn_block, heads=heads, head_ch=head_ch,
                                    max_tq=128))
    out = jax.block_until_ready(fwd(x, z, params))

    ref = _reference(x, z, params, heads=heads, head_ch=head_ch)
    assert out.shape == (b, c, h, w)
    # Tolerance covers pl.reciprocal(approx=True) and reordered/fused accumulation.
    assert jnp.allclose(out, ref, atol=5e-3, rtol=5e-3), (
        "mismatch vs reference: max abs err "
        f"{float(jnp.max(jnp.abs(out - ref))):.3e}")

    print("KERNEL_OK")
</pallas_src>

<mosaic_0001>
module attributes {stable_mosaic.version = 11 : i64} {
  func.func @_cross_attn_kernel(%arg0: i32, %arg1: i32, %arg2: memref<1x4x128xf32, #tpu.memory_space<vmem>>, %arg3: memref<1x4x256xf32, #tpu.memory_space<vmem>>, %arg4: memref<8x4xf32, #tpu.memory_space<vmem>>, %arg5: memref<8x1xf32, #tpu.memory_space<vmem>>, %arg6: memref<8x4xf32, #tpu.memory_space<vmem>>, %arg7: memref<8x1xf32, #tpu.memory_space<vmem>>, %arg8: memref<4x8xf32, #tpu.memory_space<vmem>>, %arg9: memref<4x1xf32, #tpu.memory_space<vmem>>, %arg10: memref<1x4x128xf32, #tpu.memory_space<vmem>>, %arg11: memref<128x8xf32, #tpu.memory_space<vmem>>) attributes {dimension_semantics = [#tpu.dimension_semantics<parallel>, #tpu.dimension_semantics<parallel>], iteration_bounds = array<i64: 2, 2>, scalar_prefetch = 0 : i64, scratch_operands = 1 : i64, tpu.core_type = #tpu.core_type<tc>, window_params = [{transform_indices = @transform_0, window_bounds = array<i64: 1, 4, 128>}, {transform_indices = @transform_1, window_bounds = array<i64: 1, 4, 256>}, {pipeline_mode = #tpu.pipeline_mode<synchronous>, transform_indices = @transform_2, window_bounds = array<i64: 8, 4>}, {pipeline_mode = #tpu.pipeline_mode<synchronous>, transform_indices = @transform_3, window_bounds = array<i64: 8, 1>}, {pipeline_mode = #tpu.pipeline_mode<synchronous>, transform_indices = @transform_4, window_bounds = array<i64: 8, 4>}, {pipeline_mode = #tpu.pipeline_mode<synchronous>, transform_indices = @transform_5, window_bounds = array<i64: 8, 1>}, {pipeline_mode = #tpu.pipeline_mode<synchronous>, transform_indices = @transform_6, window_bounds = array<i64: 4, 8>}, {pipeline_mode = #tpu.pipeline_mode<synchronous>, transform_indices = @transform_7, window_bounds = array<i64: 4, 1>}, {transform_indices = @transform_8, window_bounds = array<i64: 1, 4, 128>}]} {
    %c0 = arith.constant 0 : index
    %c0_0 = arith.constant 0 : index
    %c0_1 = arith.constant 0 : index
    %0 = vector.load %arg2[%c0, %c0_0, %c0_1] : memref<1x4x128xf32, #tpu.memory_space<vmem>>, vector<1x4x128xf32>
    %1 = vector.shape_cast %0 : vector<1x4x128xf32> to vector<4x128xf32>
    %c0_2 = arith.constant 0 : index
    %c0_3 = arith.constant 0 : index
    %c0_4 = arith.constant 0 : index
    %2 = vector.load %arg3[%c0_2, %c0_3, %c0_4] : memref<1x4x256xf32, #tpu.memory_space<vmem>>, vector<1x4x256xf32>
    %3 = vector.shape_cast %2 : vector<1x4x256xf32> to vector<4x256xf32>
    %c0_5 = arith.constant 0 : index
    %c0_6 = arith.constant 0 : index
    %4 = vector.load %arg4[%c0_5, %c0_6] : memref<8x4xf32, #tpu.memory_space<vmem>>, vector<8x4xf32>
    %cst = arith.constant dense<0.000000e+00> : vector<8x256xf32>
    %5 = tpu.matmul %4, %3, %cst {dimension_numbers = #tpu.dot_dimension_numbers<[1], [0], [0], [1], [0, 0, 1, 1], [], []>} : vector<8x4xf32>, vector<4x256xf32>, vector<8x256xf32> -> vector<8x256xf32>
    %c0_7 = arith.constant 0 : index
    %c0_8 = arith.constant 0 : index
    %6 = vector.load %arg5[%c0_7, %c0_8] : memref<8x1xf32, #tpu.memory_space<vmem>>, vector<8x1xf32>
    %7 = vector.broadcast %6 : vector<8x1xf32> to vector<8x256xf32>
    %8 = arith.addf %5, %7 : vector<8x256xf32>
    %c0_9 = arith.constant 0 : index
    %c0_10 = arith.constant 0 : index
    %9 = vector.load %arg6[%c0_9, %c0_10] : memref<8x4xf32, #tpu.memory_space<vmem>>, vector<8x4xf32>
    %cst_11 = arith.constant dense<0.000000e+00> : vector<8x256xf32>
    %10 = tpu.matmul %9, %3, %cst_11 {dimension_numbers = #tpu.dot_dimension_numbers<[1], [0], [0], [1], [0, 0, 1, 1], [], []>} : vector<8x4xf32>, vector<4x256xf32>, vector<8x256xf32> -> vector<8x256xf32>
    %c0_12 = arith.constant 0 : index
    %c0_13 = arith.constant 0 : index
    %11 = vector.load %arg7[%c0_12, %c0_13] : memref<8x1xf32, #tpu.memory_space<vmem>>, vector<8x1xf32>
    %12 = vector.broadcast %11 : vector<8x1xf32> to vector<8x256xf32>
    %13 = arith.addf %10, %12 : vector<8x256xf32>
    %cst_14 = arith.constant 5.000000e-01 : f32
    %14 = vector.broadcast %cst_14 : f32 to vector<4x128xf32>
    %15 = arith.mulf %1, %14 : vector<4x128xf32>
    %16 = tpu.transpose %15, [1, 0] : vector<4x128xf32> -> vector<128x4xf32>
    %17 = vector.extract_strided_slice %8 {offsets = [0, 0], sizes = [4, 256], strides = [1, 1]} : vector<8x256xf32> to vector<4x256xf32>
    %18 = vector.extract_strided_slice %13 {offsets = [0, 0], sizes = [4, 256], strides = [1, 1]} : vector<8x256xf32> to vector<4x256xf32>
    %cst_15 = arith.constant dense<0.000000e+00> : vector<128x256xf32>
    %19 = tpu.matmul %16, %17, %cst_15 {dimension_numbers = #tpu.dot_dimension_numbers<[1], [0], [0], [1], [0, 0, 1, 1], [], []>} : vector<128x4xf32>, vector<4x256xf32>, vector<128x256xf32> -> vector<128x256xf32>
    %cst_16 = arith.constant dense<0xFF800000> : vector<128xf32>
    %20 = vector.multi_reduction <maximumf>, %19, %cst_16 [1] : vector<128x256xf32> to vector<128xf32>
    %21 = vector.shape_cast %20 : vector<128xf32> to vector<128x1xf32>
    %22 = vector.broadcast %21 : vector<128x1xf32> to vector<128x256xf32>
    %23 = arith.subf %19, %22 : vector<128x256xf32>
    %24 = math.exp %23 : vector<128x256xf32>
    %cst_17 = arith.constant dense<0.000000e+00> : vector<128xf32>
    %25 = vector.multi_reduction <add>, %24, %cst_17 [1] : vector<128x256xf32> to vector<128xf32>
    %26 = vector.shape_cast %25 : vector<128xf32> to vector<128x1xf32>
    %cst_18 = arith.constant dense<0.000000e+00> : vector<128x4xf32>
    %27 = tpu.matmul %24, %18, %cst_18 {dimension_numbers = #tpu.dot_dimension_numbers<[1], [1], [0], [0], [0, 0, 1, 0], [], []>} : vector<128x256xf32>, vector<4x256xf32>, vector<128x4xf32> -> vector<128x4xf32>
    %28 = tpu.reciprocal %26 {approx = true} : vector<128x1xf32> -> vector<128x1xf32>
    %29 = vector.broadcast %28 : vector<128x1xf32> to vector<128x4xf32>
    %30 = arith.mulf %27, %29 : vector<128x4xf32>
    %c0_19 = arith.constant 0 : index
    %c0_20 = arith.constant 0 : index
    %31 = vector.load %arg11[%c0_19, %c0_20] : memref<128x8xf32, #tpu.memory_space<vmem>>, vector<128x4xf32>
    tpu.vector_store %arg11[%c0_19, %c0_20], %30 {strides = array<i32>} : memref<128x8xf32, #tpu.memory_space<vmem>>, vector<128x4xf32>,
    %32 = vector.extract_strided_slice %8 {offsets = [4, 0], sizes = [4, 256], strides = [1, 1]} : vector<8x256xf32> to vector<4x256xf32>
    %33 = vector.extract_strided_slice %13 {offsets = [4, 0], sizes = [4, 256], strides = [1, 1]} : vector<8x256xf32> to vector<4x256xf32>
    %cst_21 = arith.constant dense<0.000000e+00> : vector<128x256xf32>
    %34 = tpu.matmul %16, %32, %cst_21 {dimension_numbers = #tpu.dot_dimension_numbers<[1], [0], [0], [1], [0, 0, 1, 1], [], []>} : vector<128x4xf32>, vector<4x256xf32>, vector<128x256xf32> -> vector<128x256xf32>
    %cst_22 = arith.constant dense<0xFF800000> : vector<128xf32>
    %35 = vector.multi_reduction <maximumf>, %34, %cst_22 [1] : vector<128x256xf32> to vector<128xf32>
    %36 = vector.shape_cast %35 : vector<128xf32> to vector<128x1xf32>
    %37 = vector.broadcast %36 : vector<128x1xf32> to vector<128x256xf32>
    %38 = arith.subf %34, %37 : vector<128x256xf32>
    %39 = math.exp %38 : vector<128x256xf32>
    %cst_23 = arith.constant dense<0.000000e+00> : vector<128xf32>
    %40 = vector.multi_reduction <add>, %39, %cst_23 [1] : vector<128x256xf32> to vector<128xf32>
    %41 = vector.shape_cast %40 : vector<128xf32> to vector<128x1xf32>
    %cst_24 = arith.constant dense<0.000000e+00> : vector<128x4xf32>
    %42 = tpu.matmul %39, %33, %cst_24 {dimension_numbers = #tpu.dot_dimension_numbers<[1], [1], [0], [0], [0, 0, 1, 0], [], []>} : vector<128x256xf32>, vector<4x256xf32>, vector<128x4xf32> -> vector<128x4xf32>
    %43 = tpu.reciprocal %41 {approx = true} : vector<128x1xf32> -> vector<128x1xf32>
    %44 = vector.broadcast %43 : vector<128x1xf32> to vector<128x4xf32>
    %45 = arith.mulf %42, %44 : vector<128x4xf32>
    %c0_25 = arith.constant 0 : index
    %c4 = arith.constant 4 : index
    %46 = vector.load %arg11[%c0_25, %c4] : memref<128x8xf32, #tpu.memory_space<vmem>>, vector<128x4xf32>
    tpu.vector_store %arg11[%c0_25, %c4], %45 {strides = array<i32>} : memref<128x8xf32, #tpu.memory_space<vmem>>, vector<128x4xf32>,
    %c0_26 = arith.constant 0 : index
    %c0_27 = arith.constant 0 : index
    %47 = vector.load %arg8[%c0_26, %c0_27] : memref<4x8xf32, #tpu.memory_space<vmem>>, vector<4x8xf32>
    %c0_28 = arith.constant 0 : index
    %c0_29 = arith.constant 0 : index
    %48 = vector.load %arg11[%c0_28, %c0_29] : memref<128x8xf32, #tpu.memory_space<vmem>>, vector<128x8xf32>
    %cst_30 = arith.constant dense<0.000000e+00> : vector<4x128xf32>
    %49 = tpu.matmul %47, %48, %cst_30 {dimension_numbers = #tpu.dot_dimension_numbers<[1], [1], [0], [0], [0, 0, 1, 0], [], []>} : vector<4x8xf32>, vector<128x8xf32>, vector<4x128xf32> -> vector<4x128xf32>
    %50 = arith.addf %1, %49 : vector<4x128xf32>
    %c0_31 = arith.constant 0 : index
    %c0_32 = arith.constant 0 : index
    %51 = vector.load %arg9[%c0_31, %c0_32] : memref<4x1xf32, #tpu.memory_space<vmem>>, vector<4x1xf32>
    %52 = vector.broadcast %51 : vector<4x1xf32> to vector<4x128xf32>
    %53 = arith.addf %50, %52 : vector<4x128xf32>
    %c0_33 = arith.constant 0 : index
    %c0_34 = arith.constant 0 : index
    %c0_35 = arith.constant 0 : index
    %54 = vector.load %arg10[%c0_33, %c0_34, %c0_35] : memref<1x4x128xf32, #tpu.memory_space<vmem>>, vector<1x4x128xf32>
    %55 = vector.shape_cast %54 : vector<1x4x128xf32> to vector<4x128xf32>
    %56 = vector.shape_cast %53 : vector<4x128xf32> to vector<1x4x128xf32>
    tpu.vector_store %arg10[%c0_33, %c0_34, %c0_35], %56 {strides = array<i32>} : memref<1x4x128xf32, #tpu.memory_space<vmem>>, vector<1x4x128xf32>,
    return
  }
  func.func @transform_0(%arg0: i32, %arg1: i32) -> (i32, i32, i32) {
    %c0_i32 = arith.constant 0 : i32
    %c0_i32_0 = arith.constant 0 : i32
    return %arg0, %c0_i32, %arg1 : i32, i32, i32
  }
  func.func @transform_1(%arg0: i32, %arg1: i32) -> (i32, i32, i32) {
    %c0_i32 = arith.constant 0 : i32
    %c0_i32_0 = arith.constant 0 : i32
    %c0_i32_1 = arith.constant 0 : i32
    return %arg0, %c0_i32, %c0_i32_0 : i32, i32, i32
  }
  func.func @transform_2(%arg0: i32, %arg1: i32) -> (i32, i32) {
    %c0_i32 = arith.constant 0 : i32
    %c0_i32_0 = arith.constant 0 : i32
    %c0_i32_1 = arith.constant 0 : i32
    return %c0_i32, %c0_i32_0 : i32, i32
  }
  func.func @transform_3(%arg0: i32, %arg1: i32) -> (i32, i32) {
    %c0_i32 = arith.constant 0 : i32
    %c0_i32_0 = arith.constant 0 : i32
    %c0_i32_1 = arith.constant 0 : i32
    return %c0_i32, %c0_i32_0 : i32, i32
  }
  func.func @transform_4(%arg0: i32, %arg1: i32) -> (i32, i32) {
    %c0_i32 = arith.constant 0 : i32
    %c0_i32_0 = arith.constant 0 : i32
    %c0_i32_1 = arith.constant 0 : i32
    return %c0_i32, %c0_i32_0 : i32, i32
  }
  func.func @transform_5(%arg0: i32, %arg1: i32) -> (i32, i32) {
    %c0_i32 = arith.constant 0 : i32
    %c0_i32_0 = arith.constant 0 : i32
    %c0_i32_1 = arith.constant 0 : i32
    return %c0_i32, %c0_i32_0 : i32, i32
  }
  func.func @transform_6(%arg0: i32, %arg1: i32) -> (i32, i32) {
    %c0_i32 = arith.constant 0 : i32
    %c0_i32_0 = arith.constant 0 : i32
    %c0_i32_1 = arith.constant 0 : i32
    return %c0_i32, %c0_i32_0 : i32, i32
  }
  func.func @transform_7(%arg0: i32, %arg1: i32) -> (i32, i32) {
    %c0_i32 = arith.constant 0 : i32
    %c0_i32_0 = arith.constant 0 : i32
    %c0_i32_1 = arith.constant 0 : i32
    return %c0_i32, %c0_i32_0 : i32, i32
  }
  func.func @transform_8(%arg0: i32, %arg1: i32) -> (i32, i32, i32) {
    %c0_i32 = arith.constant 0 : i32
    %c0_i32_0 = arith.constant 0 : i32
    return %arg0, %c0_i32, %arg1 : i32, i32, i32
  }
}

</mosaic_0001>

<bundles_post_ra>
// kernel: cross_attn_block.1
= control target key start
LH: loop header
LB: loop body
LE: loop exit
PB: predicated region body
PF: predicated region fallthrough
CT: control target
= control target key end

     0   :  { %s2519_s27 = smov 0   ;;  %s2521_s28 = smov 0   ;;  %s3088_s0 = inlined_call_operand.vmem [shape: f32[2,4,256], index: 0, kind: input, shape index: {}]   ;;  %s3089_s1 = inlined_call_operand.vmem [shape: f32[2,4,256], index: 1, kind: input, shape index: {}]   ;;  %s3090_s2 = inlined_call_operand.vmem [shape: f32[8,4], index: 2, kind: input, shape index: {}]   ;;  %s3091_s3 = inlined_call_operand.vmem [shape: f32[8,1], index: 3, kind: input, shape index: {}]   ;;  %s3092_s4 = inlined_call_operand.vmem [shape: f32[8,4], index: 4, kind: input, shape index: {}]   ;;  %s3093_s5 = inlined_call_operand.vmem [shape: f32[8,1], index: 5, kind: input, shape index: {}]   ;;  %s3094_s6 = inlined_call_operand.vmem [shape: f32[4,8], index: 6, kind: input, shape index: {}]   ;;  %s3095_s7 = inlined_call_operand.vmem [shape: f32[4,1], index: 7, kind: input, shape index: {}]   ;;  %s3096_s8 = inlined_call_operand.vmem [shape: f32[2,4,256], index: 8, kind: output, shape index: {}]  }
   0x1   :  { %s2523_s29 = smov 0   ;;  %s2525_s30 = smov 0  }
   0x2   :  { %s2527_s9 = smov 0  }
   0x3 LB: > { %s27_s10 = sadd.s32 1, %s2459_s29  ;;  %s30_s11 = sadd.s32 1, %s2463_s30  ;;  %s2467_s9 = sphi %s2527_s9, %s18_s9   ;;  %s2463_s30 = sphi %s2525_s30, %s3158_s30   ;;  %s2459_s29 = sphi %s2523_s29, %s3157_s29   ;;  %s2455_s28 = sphi %s2521_s28, %s3156_s28   ;;  %s2451_s27 = sphi %s2519_s27, %s3155_s27  }
   0x4   : > { %p28_p0 = scmp.ge.s32.totalorder %s27_s10, 2  ;;  %p2035_p1 = scmp.ge.s32.totalorder %s2467_s9, 1 }
   0x5   : > { %p291_p2 = scmp.lt.s32.totalorder %s2467_s9, 5 }
   0x6   : > { %s3160_s10 = smov (%p28_p0, %s27_s10), 0  ;;  %s3162_s11 = smov (!%p28_p0, %s30_s11), %s2463_s30 }
   0x7   : > { %p292_p3 = pnand %p2035_p1, %p291_p2  ;;  %p32_p4 = scmp.ge.s32.totalorder %s3162_s11, 2 }
   0x9   : > { %s3164_s11 = smov (%p32_p4, %s3162_s11), 0  ;;  %295 = sbr.rel (%p292_p3) target bundleno = 1409 (0x581), region = 52 }
  0x10   : > { %p336_p5 = scmp.lt.s32.totalorder %s2455_s28, 1  ;;  %v3097_v0 = vmov 0.0   ;;  %v2470_v1 = vmov 0   ;;  %v360_v2 = vld [vmem:[%s3091_s3] sm:$0xff]  ;;  %vm372_vm0 = vcmask 1043456   ;;  %vm368_vm1 = vcmask 31744  }
  0x11   : > { %441 = vmatprep.mubr.f32.mxu0 %v3097_v0  ;;  %2233 = vset.pattern.permute.xlu0 %v2470_v1  ;;  %v359_v5 = vld [vmem:[%s3090_s2] sm:$0xff]  ;;  %p338_p6 = scmp.lt.s32.totalorder %s2451_s27, 1  ;;  %s2471_s13 = smov 4   ;;  %vm1768_vm2 = vcmask 64544   ;;  %vm2473_vm3 = vmmov 0   ;;  %vm1802_vm4 = vcmask 64512  }
  0x12   : > { %s3166_s28 = smov (!%p336_p5, %s2455_s28), 1  ;;  %363 = vperm.xlu0 %2233, %v360_v2   ;;  %522 = vmatprep.mubr.f32.mxu1 %v3097_v0  ;;  %v448_v18 = vld [vmem:[%s3092_s4] sm:$0xff]  ;;  %vm3019_vm5 = vmpackc.low %vm1802_vm4, %vm1802_vm4 }
  0x13   : > { %2234 = vset.pattern.permute.xlu1 %v2470_v1  ;;  %s2103_s14 = sshll.u32 %s3166_s28, 3  ;;  %s3168_s27 = smov (!%p338_p6, %s2451_s27), 1  ;;  %v449_v58 = vld [vmem:[%s3093_s5] sm:$0xff] }
  0x14   : > { %s348_s17 = scalar_lea.vmem %s3089_s1, %s2103_s14  ;;  %s2036_s20 = sshll.u32 %s3166_s28, 1 }
  0x15   : > { %v358_v3 = vld [vmem:[%s348_s17] sm:$0xff]  ;;  %s2570_s21 = sadd.s32 %s2036_s20, %s3168_s27 }
  0x16   : > { %v367_v4 = vcombine.high %v358_v3, %v358_v3  ;;  %s2037_s22 = sshll.u32 %s2570_s21, 2 }
  0x17   : > { %s2578_s25 = scalar_lea.vmem %s3088_s0, %s2037_s22  ;;  %s356_s20 = scalar_lea.vmem %s3096_s8, %s2037_s22 }
  0x18   : > { %2042 = vmatprep.subr.msk.mxu0 %vm372_vm0, %v367_v4  ;;  %2045 = vmatprep.subr.msk.mxu1 %vm372_vm0, %v367_v4  ;;  %v357_v6 = vld [vmem:[%s2578_s25] sm:$0xf] }
  0x19   : > { %2043 = vmatpush1.msk.msra.mxu0 %vm372_vm0, %v358_v3  ;;  %2046 = vmatpush1.msk.msra.mxu1 %vm372_vm0, %v358_v3  ;;  %v529_v7 = vmul.f32 0.5, %v357_v6 }
  0x1a   : > { %2044 = vmatmul.mubr.msk.f32.vlgmr.msra.gmra.mrb[0].mxu0 %vm368_vm1, %v359_v5  ;;  %2047 = vmatmul.mubr.msk.f32.vlgmr.msra.gmra.mrb[0].mxu1 %vm368_vm1, %v448_v18 }
  0x1b   : > { %680 = vmatprep.mubr.f32.mxu0 %v3097_v0 }
  0x30   : > { %530 = vxpose.xlu0.b32.start.end [1/1] (short) %v529_v7, 128 }
  0x91   : > { %v364_v8 = vpop.permute.xlu0 %363 }
  0xb0   : > { %v546_v9 = vpop.trf.xlu0 }
  0xb4   : > { %v547_v10 = vpop.trf.xlu0 }
  0xb8   : > { %v548_v11 = vpop.trf.xlu0 }
  0xbc   : > { %v2581_v12 = vpop.trf.xlu0 }
  0xc0   : > { %v2583_v13 = vpop.trf.xlu0 }
  0xc4   : > { %v551_v19 = vpop.trf.xlu0 }
  0xc8   : > { %v552_v22 = vpop.trf.xlu0 }
  0xcc   : > { %v553_v23 = vpop.trf.xlu0 }
  0xd0   : > { %v554_v24 = vpop.trf.xlu0 }
  0xd4   : > { %v555_v25 = vpop.trf.xlu0 }
  0xd8   : > { %v556_v26 = vpop.trf.xlu0 }
  0xdc   : > { %v557_v27 = vpop.trf.xlu0 }
  0xe0   : > { %v558_v28 = vpop.trf.xlu0 }
  0xe4   : > { %v559_v29 = vpop.trf.xlu0 }
  0xe8   : > { %v560_v30 = vpop.trf.xlu0 }
  0xec   : > { %v561_v31 = vpop.trf.xlu0 }
  0xed   : > { %v443_v14 = vpop.f32.mrb[0].mxu0  ;;  %v2721_v62 = vpop.f32.mrb[0].mxu1 }
  0xee   : > { %v444_v15 = vadd.f32 %v443_v14, %v364_v8  ;;  %v445_v16 = vpop.f32.mrb[1].mxu0  ;;  %v2725_v1 = vpop.f32.mrb[1].mxu1 }
  0xef   : > { %v446_v17 = vadd.f32 %v445_v16, %v364_v8 }
  0xf0   : > { %v1162_v21 = vrot.slane %v444_v15, 4 }
  0xf1   : > { %v1163_v20 = vrot.slane %v446_v17, 4  ;;  %2048 = vmatprep.subr.msk.mxu0 %vm372_vm0, %v446_v17 }
  0xf2   : > { %2049 = vmatpush1.msk.msra.mxu0 %vm372_vm0, %v444_v15 }
  0xf3   : > { %2050 = vmatmul.mubr.msk.f32.vlgmr.msra.gmra.mrb[2].mxu0 %vm368_vm1, %v546_v9  ;;  %2066 = vmatprep.subr.msk.mxu0 %vm372_vm0, %v1163_v20 }
  0xf4   : > { %2067 = vmatpush1.msk.msra.mxu0 %vm372_vm0, %v1162_v21  ;;  %686 = vmatprep.mubr.f32.mxu0 %v3097_v0 }
  0xf7   : > { %2051 = vmatmul.mubr.msk.f32.gmra.mrb[4].mxu0 %vm368_vm1, %v547_v10 }
  0xf8   : > { %692 = vmatprep.mubr.f32.mxu0 %v3097_v0 }
  0xfb   : > { %2052 = vmatmul.mubr.msk.f32.gmra.mrb[6].mxu0 %vm368_vm1, %v548_v11 }
  0xfc   : > { %698 = vmatprep.mubr.f32.mxu0 %v3097_v0 }
  0xff   : > { %2053 = vmatmul.mubr.msk.f32.gmra.mrb[8].mxu0 %vm368_vm1, %v2581_v12 }
 0x100   : > { %704 = vmatprep.mubr.f32.mxu0 %v3097_v0 }
 0x103   : > { %2054 = vmatmul.mubr.msk.f32.gmra.mrb[10].mxu0 %vm368_vm1, %v2583_v13 }
 0x104   : > { %710 = vmatprep.mubr.f32.mxu0 %v3097_v0 }
 0x107   : > { %2055 = vmatmul.mubr.msk.f32.gmra.mrb[12].mxu0 %vm368_vm1, %v551_v19 }
 0x108   : > { %716 = vmatprep.mubr.f32.mxu0 %v3097_v0 }
 0x10b   : > { %2056 = vmatmul.mubr.msk.f32.gmra.mrb[14].mxu0 %vm368_vm1, %v552_v22 }
 0x10c   : > { %722 = vmatprep.mubr.f32.mxu0 %v3097_v0 }
 0x10f   : > { %2057 = vmatmul.mubr.msk.f32.gmra.mrb[16].mxu0 %vm368_vm1, %v553_v23 }
 0x110   : > { %728 = vmatprep.mubr.f32.mxu0 %v3097_v0 }
 0x113   : > { %2058 = vmatmul.mubr.msk.f32.gmra.mrb[18].mxu0 %vm368_vm1, %v554_v24 }
 0x114   : > { %734 = vmatprep.mubr.f32.mxu0 %v3097_v0 }
 0x117   : > { %2059 = vmatmul.mubr.msk.f32.gmra.mrb[20].mxu0 %vm368_vm1, %v555_v25 }
 0x118   : > { %740 = vmatprep.mubr.f32.mxu0 %v3097_v0 }
 0x11b   : > { %2060 = vmatmul.mubr.msk.f32.gmra.mrb[22].mxu0 %vm368_vm1, %v556_v26 }
 0x11c   : > { %746 = vmatprep.mubr.f32.mxu0 %v3097_v0 }
 0x11f   : > { %2061 = vmatmul.mubr.msk.f32.gmra.mrb[24].mxu0 %vm368_vm1, %v557_v27 }
 0x120   : > { %752 = vmatprep.mubr.f32.mxu0 %v3097_v0 }
 0x123   : > { %2062 = vmatmul.mubr.msk.f32.gmra.mrb[26].mxu0 %vm368_vm1, %v558_v28 }
 0x124   : > { %758 = vmatprep.mubr.f32.mxu0 %v3097_v0 }
 0x127   : > { %2063 = vmatmul.mubr.msk.f32.gmra.mrb[28].mxu0 %vm368_vm1, %v559_v29 }
 0x128   : > { %764 = vmatprep.mubr.f32.mxu0 %v3097_v0 }
 0x12b   : > { %2064 = vmatmul.mubr.msk.f32.gmra.mrb[30].mxu0 %vm368_vm1, %v560_v30 }
 0x12c   : > { %770 = vmatprep.mubr.f32.mxu0 %v3097_v0 }
 0x12f   : > { %2065 = vmatmul.mubr.msk.f32.gmra.mrb[32].mxu0 %vm368_vm1, %v561_v31 }
 0x130   : > { %1232 = vmatprep.mubr.f32.mxu0 %v3097_v0 }
 0x133   : > { %2068 = vmatmul.mubr.msk.f32.vlgmr.msra.gmra.mrb[34].mxu0 %vm368_vm1, %v546_v9 }
 0x134   : > { %1238 = vmatprep.mubr.f32.mxu0 %v3097_v0 }
 0x137   : > { %2069 = vmatmul.mubr.msk.f32.gmra.mrb[36].mxu0 %vm368_vm1, %v547_v10 }
 0x138   : > { %1244 = vmatprep.mubr.f32.mxu0 %v3097_v0 }
 0x13b   : > { %2070 = vmatmul.mubr.msk.f32.gmra.mrb[38].mxu0 %vm368_vm1, %v548_v11 }
 0x13c   : > { %1250 = vmatprep.mubr.f32.mxu0 %v3097_v0 }
 0x13f   : > { %2071 = vmatmul.mubr.msk.f32.gmra.mrb[40].mxu0 %vm368_vm1, %v2581_v12 }
 0x140   : > { %1256 = vmatprep.mubr.f32.mxu0 %v3097_v0 }
 0x143   : > { %2072 = vmatmul.mubr.msk.f32.gmra.mrb[42].mxu0 %vm368_vm1, %v2583_v13 }
 0x144   : > { %1262 = vmatprep.mubr.f32.mxu0 %v3097_v0 }
 0x147   : > { %2073 = vmatmul.mubr.msk.f32.gmra.mrb[44].mxu0 %vm368_vm1, %v551_v19 }
 0x148   : > { %1268 = vmatprep.mubr.f32.mxu0 %v3097_v0 }
 0x14b   : > { %2074 = vmatmul.mubr.msk.f32.gmra.mrb[46].mxu0 %vm368_vm1, %v552_v22 }
 0x14c   : > { %1274 = vmatprep.mubr.f32.mxu0 %v3097_v0 }
 0x14f   : > { %2075 = vmatmul.mubr.msk.f32.gmra.mrb[48].mxu0 %vm368_vm1, %v553_v23 }
 0x150   : > { %1280 = vmatprep.mubr.f32.mxu0 %v3097_v0 }
 0x153   : > { %2076 = vmatmul.mubr.msk.f32.gmra.mrb[50].mxu0 %vm368_vm1, %v554_v24 }
 0x154   : > { %1286 = vmatprep.mubr.f32.mxu0 %v3097_v0 }
 0x157   : > { %2077 = vmatmul.mubr.msk.f32.gmra.mrb[52].mxu0 %vm368_vm1, %v555_v25 }
 0x158   : > { %1292 = vmatprep.mubr.f32.mxu0 %v3097_v0 }
 0x15b   : > { %2078 = vmatmul.mubr.msk.f32.gmra.mrb[54].mxu0 %vm368_vm1, %v556_v26 }
 0x15c   : > { %1298 = vmatprep.mubr.f32.mxu0 %v3097_v0 }
 0x15f   : > { %2079 = vmatmul.mubr.msk.f32.gmra.mrb[56].mxu0 %vm368_vm1, %v557_v27 }
 0x160   : > { %1304 = vmatprep.mubr.f32.mxu0 %v3097_v0 }
 0x163   : > { %2080 = vmatmul.mubr.msk.f32.gmra.mrb[58].mxu0 %vm368_vm1, %v558_v28 }
 0x164   : > { %1310 = vmatprep.mubr.f32.mxu0 %v3097_v0 }
 0x167   : > { %2081 = vmatmul.mubr.msk.f32.gmra.mrb[60].mxu0 %vm368_vm1, %v559_v29 }
 0x168   : > { %1316 = vmatprep.mubr.f32.mxu0 %v3097_v0 }
 0x16b   : > { %2082 = vmatmul.mubr.msk.f32.gmra.mrb[62].mxu0 %vm368_vm1, %v560_v30 }
 0x16c   : > { %1322 = vmatprep.mubr.f32.mxu0 %v3097_v0 }
 0x16f   : > { %2083 = vmatmul.mubr.msk.f32.gmra.mrb[64].mxu0 %vm368_vm1, %v561_v31 }
 0x1c6   : > { %v2660_v32 = vpop.f32.mrb[2].mxu0 }
 0x1c7   : > { %v2662_v33 = vpop.f32.mrb[3].mxu0 }
 0x1c8   : > { %v777_v34 = vmax.f32 %v2660_v32, %v2662_v33 }
 0x1ca   : > { %778 = vmax.xlane.f32.xlu1 %v777_v34  ;;  %v2666_v35 = vpop.f32.mrb[4].mxu0 }
 0x1cb   : > { %v2668_v36 = vpop.f32.mrb[5].mxu0 }
 0x1cc   : > { %v780_v37 = vmax.f32 %v2666_v35, %v2668_v36 }
 0x1ce   : > { %781 = vmax.xlane.f32.xlu1 %v780_v37  ;;  %v2672_v38 = vpop.f32.mrb[6].mxu0 }
 0x1cf   : > { %v2674_v39 = vpop.f32.mrb[7].mxu0 }
 0x1d0   : > { %v783_v40 = vmax.f32 %v2672_v38, %v2674_v39 }
 0x1d2   : > { %784 = vmax.xlane.f32.xlu1 %v783_v40  ;;  %v2678_v41 = vpop.f32.mrb[8].mxu0 }
 0x1d3   : > { %v2680_v42 = vpop.f32.mrb[9].mxu0 }
 0x1d4   : > { %v786_v43 = vmax.f32 %v2678_v41, %v2680_v42 }
 0x1d6   : > { %787 = vmax.xlane.f32.xlu1 %v786_v43  ;;  %v2684_v44 = vpop.f32.mrb[10].mxu0 }
 0x1d7   : > { %v2686_v45 = vpop.f32.mrb[11].mxu0 }
 0x1d8   : > { %v789_v46 = vmax.f32 %v2684_v44, %v2686_v45 }
 0x1da   : > { %790 = vmax.xlane.f32.xlu1 %v789_v46  ;;  %v2690_v47 = vpop.f32.mrb[12].mxu0 }
 0x1db   : > { %v2692_v48 = vpop.f32.mrb[13].mxu0 }
 0x1dc   : > { %v792_v49 = vmax.f32 %v2690_v47, %v2692_v48 }
 0x1de   : > { %793 = vmax.xlane.f32.xlu0 %v792_v49  ;;  %v2696_v50 = vpop.f32.mrb[14].mxu0 }
 0x1df   : > { %v2698_v51 = vpop.f32.mrb[15].mxu0 }
 0x1e0   : > { %v795_v52 = vmax.f32 %v2696_v50, %v2698_v51 }
 0x1e2   : > { %v2702_v53 = vpop.f32.mrb[16].mxu0 }
 0x1e3   : > { %v2704_v54 = vpop.f32.mrb[17].mxu0 }
 0x1e4   : > { %v798_v55 = vmax.f32 %v2702_v53, %v2704_v54 }
 0x1e6   : > { %v2708_v56 = vpop.f32.mrb[18].mxu0 }
 0x1e7   : > { %v2710_v57 = vpop.f32.mrb[19].mxu0 }
 0x1e8   : > { %v801_v59 = vmax.f32 %v2708_v56, %v2710_v57 }
 0x1ea   : > { %v2717_v60 = vpop.f32.mrb[20].mxu0 }
 0x1eb   : > { %452 = vperm.xlu1 %2234, %v449_v58   ;;  %v2719_v61 = vpop.f32.mrb[21].mxu0 }
 0x1ec   : > { %v804_v63 = vmax.f32 %v2717_v60, %v2719_v61 }
 0x1ee   : > { %v2727_v2 = vpop.f32.mrb[22].mxu0 }
 0x1ef   : > { %v2729_v3 = vpop.f32.mrb[23].mxu0 }
 0x1f0   : > { %v807_v4 = vmax.f32 %v2727_v2, %v2729_v3 }
 0x1f2   : > { %v2733_v5 = vpop.f32.mrb[24].mxu0 }
 0x1f3   : > { %v2735_v6 = vpop.f32.mrb[25].mxu0 }
 0x1f4   : > { %v810_v7 = vmax.f32 %v2733_v5, %v2735_v6 }
 0x1f6   : > { %v2739_v8 = vpop.f32.mrb[26].mxu0 }
 0x1f7   : > { %v2741_v9 = vpop.f32.mrb[27].mxu0 }
 0x1f8   : > { %v813_v10 = vmax.f32 %v2739_v8, %v2741_v9 }
 0x1fa   : > { %v2745_v11 = vpop.f32.mrb[28].mxu0 }
 0x1fb   : > { %v2747_v12 = vpop.f32.mrb[29].mxu0 }
 0x1fc   : > { %v816_v13 = vmax.f32 %v2745_v11, %v2747_v12 }
 0x1fe   : > { %v2751_v14 = vpop.f32.mrb[30].mxu0 }
 0x1ff   : > { %v2753_v15 = vpop.f32.mrb[31].mxu0 }
 0x200   : > { %v819_v16 = vmax.f32 %v2751_v14, %v2753_v15 }
 0x202   : > { %v2757_v17 = vpop.f32.mrb[32].mxu0 }
 0x203   : > { %v2759_v18 = vpop.f32.mrb[33].mxu0 }
 0x204   : > { %v822_v19 = vmax.f32 %v2757_v17, %v2759_v18 }
 0x206   : > { %v2763_v20 = vpop.f32.mrb[34].mxu0 }
 0x207   : > { %v2765_v21 = vpop.f32.mrb[35].mxu0 }
 0x208   : > { %v1329_v22 = vmax.f32 %v2763_v20, %v2765_v21 }
 0x20a   : > { %v2769_v23 = vpop.f32.mrb[36].mxu0 }
 0x20b   : > { %v2771_v24 = vpop.f32.mrb[37].mxu0 }
 0x20c   : > { %v1332_v25 = vmax.f32 %v2769_v23, %v2771_v24 }
 0x20e   : > { %v2775_v26 = vpop.f32.mrb[38].mxu0 }
 0x20f   : > { %796 = vmax.xlane.f32.xlu1 %v795_v52  ;;  %v2777_v27 = vpop.f32.mrb[39].mxu0 }
 0x210   : > { %v1335_v28 = vmax.f32 %v2775_v26, %v2777_v27 }
 0x212   : > { %v2781_v29 = vpop.f32.mrb[40].mxu0 }
 0x213   : > { %3116 = vst [vmem:[#allocation3_spill] sm:$0xff] %v2781_v29  ;;  %799 = vmax.xlane.f32.xlu1 %v798_v55  ;;  %v2783_v30 = vpop.f32.mrb[41].mxu0 }
 0x214   : > { %3117 = vst [vmem:[#allocation4_spill] sm:$0xff] %v2783_v30  ;;  %v1338_v31 = vmax.f32 %v2781_v29, %v2783_v30 }
 0x216   : > { %v2787_v34 = vpop.f32.mrb[42].mxu0 }
 0x217   : > { %3118 = vst [vmem:[#allocation5_spill] sm:$0xff] %v2787_v34  ;;  %802 = vmax.xlane.f32.xlu1 %v801_v59  ;;  %v2789_v37 = vpop.f32.mrb[43].mxu0 }
 0x218   : > { %3119 = vst [vmem:[#allocation6_spill] sm:$0xff] %v2789_v37  ;;  %v1341_v40 = vmax.f32 %v2787_v34, %v2789_v37 }
 0x21a   : > { %v2793_v43 = vpop.f32.mrb[44].mxu0 }
 0x21b   : > { %3120 = vst [vmem:[#allocation7_spill] sm:$0xff] %v2793_v43  ;;  %805 = vmax.xlane.f32.xlu1 %v804_v63  ;;  %v2795_v46 = vpop.f32.mrb[45].mxu0 }
 0x21c   : > { %3121 = vst [vmem:[#allocation8_spill] sm:$0xff] %v2795_v46  ;;  %v1344_v49 = vmax.f32 %v2793_v43, %v2795_v46 }
 0x21e   : > { %v2799_v52 = vpop.f32.mrb[46].mxu0 }
 0x21f   : > { %3122 = vst [vmem:[#allocation9_spill] sm:$0xff] %v2799_v52  ;;  %808 = vmax.xlane.f32.xlu1 %v807_v4  ;;  %v2801_v55 = vpop.f32.mrb[47].mxu0 }
 0x220   : > { %3123 = vst [vmem:[#allocation10_spill] sm:$0xff] %v2801_v55  ;;  %v1347_v58 = vmax.f32 %v2799_v52, %v2801_v55 }
 0x222   : > { %v2805_v59 = vpop.f32.mrb[48].mxu0 }
 0x223   : > { %3124 = vst [vmem:[#allocation11_spill] sm:$0xff] %v2805_v59  ;;  %811 = vmax.xlane.f32.xlu1 %v810_v7  ;;  %v2807_v0 = vpop.f32.mrb[49].mxu0 }
 0x224   : > { %3125 = vst [vmem:[#allocation12_spill] sm:$0xff] %v2807_v0  ;;  %v1350_v63 = vmax.f32 %v2805_v59, %v2807_v0 }
 0x226   : > { %v2811_v37 = vpop.f32.mrb[50].mxu0 }
 0x227   : > { %814 = vmax.xlane.f32.xlu1 %v813_v10  ;;  %v2813_v46 = vpop.f32.mrb[51].mxu0 }
 0x228   : > { %v1353_v4 = vmax.f32 %v2811_v37, %v2813_v46 }
 0x22a   : > { %1354 = vmax.xlane.f32.xlu0 %v1353_v4  ;;  %v2817_v43 = vpop.f32.mrb[52].mxu0 }
 0x22b   : > { %3126 = vst [vmem:[#allocation13_spill] sm:$0xff] %v2817_v43  ;;  %817 = vmax.xlane.f32.xlu1 %v816_v13  ;;  %v2819_v55 = vpop.f32.mrb[53].mxu0 }
 0x22c   : > { %3127 = vst [vmem:[#allocation14_spill] sm:$0xff] %v2819_v55  ;;  %v1356_v7 = vmax.f32 %v2817_v43, %v2819_v55 }
 0x22e   : > { %v2823_v52 = vpop.f32.mrb[54].mxu0 }
 0x22f   : > { %820 = vmax.xlane.f32.xlu1 %v819_v16  ;;  %v2825_v0 = vpop.f32.mrb[55].mxu0 }
 0x230   : > { %v1359_v10 = vmax.f32 %v2823_v52, %v2825_v0 }
 0x232   : > { %1360 = vmax.xlane.f32.xlu0 %v1359_v10  ;;  %v2829_v59 = vpop.f32.mrb[56].mxu0 }
 0x233   : > { %3128 = vst [vmem:[#allocation15_spill] sm:$0xff] %v2829_v59  ;;  %v2831_v4 = vpop.f32.mrb[57].mxu0  ;;  %823 = vmax.xlane.f32.xlu1 %v822_v19 }
 0x234   : > { %3129 = vst [vmem:[#allocation16_spill] sm:$0xff] %v2831_v4  ;;  %v1362_v13 = vmax.f32 %v2829_v59, %v2831_v4 }
 0x236   : > { %v2835_v34 = vpop.f32.mrb[58].mxu0 }
 0x237   : > { %v2837_v55 = vpop.f32.mrb[59].mxu0  ;;  %1330 = vmax.xlane.f32.xlu1 %v1329_v22 }
 0x238   : > { %v1365_v16 = vmax.f32 %v2835_v34, %v2837_v55 }
 0x23a   : > { %1366 = vmax.xlane.f32.xlu0 %v1365_v16  ;;  %v2841_v43 = vpop.f32.mrb[60].mxu0 }
 0x23b   : > { %3130 = vst [vmem:[#allocation17_spill] sm:$0xff] %v2841_v43  ;;  %v2843_v10 = vpop.f32.mrb[61].mxu0  ;;  %1333 = vmax.xlane.f32.xlu1 %v1332_v25 }
 0x23c   : > { %3131 = vst [vmem:[#allocation18_spill] sm:$0xff] %v2843_v10  ;;  %v1368_v19 = vmax.f32 %v2841_v43, %v2843_v10 }
 0x23e   : > { %v2847_v30 = vpop.f32.mrb[62].mxu0 }
 0x23f   : > { %3132 = vst [vmem:[#allocation19_spill] sm:$0xff] %v2847_v30  ;;  %v2849_v4 = vpop.f32.mrb[63].mxu0  ;;  %1336 = vmax.xlane.f32.xlu1 %v1335_v28 }
 0x240   : > { %3133 = vst [vmem:[#allocation20_spill] sm:$0xff] %v2849_v4  ;;  %v1371_v22 = vmax.f32 %v2847_v30, %v2849_v4 }
 0x242   : > { %1372 = vmax.xlane.f32.xlu0 %v1371_v22  ;;  %v2853_v59 = vpop.f32.mrb[64].mxu0 }
 0x243   : > { %v2855_v16 = vpop.f32.mrb[65].mxu0  ;;  %1339 = vmax.xlane.f32.xlu1 %v1338_v31 }
 0x244   : > { %v1374_v25 = vmax.f32 %v2853_v59, %v2855_v16 }
 0x247   : > { %1342 = vmax.xlane.f32.xlu1 %v1341_v40 }
 0x24b   : > { %1345 = vmax.xlane.f32.xlu1 %v1344_v49 }
 0x24f   : > { %1348 = vmax.xlane.f32.xlu1 %v1347_v58 }
 0x253   : > { %1351 = vmax.xlane.f32.xlu1 %v1350_v63 }
 0x257   : > { %v779_v10 = vpop.xlane.xlu1 %778  ;;  %1357 = vmax.xlane.f32.xlu1 %v1356_v7 }
 0x258   : > { %v825_v28 = vsub.f32 %v2660_v32, %v779_v10  ;;  %v826_v43 = vsub.f32 %v2662_v33, %v779_v10 }
 0x25a   : > { %v857_v29 = vmul.f32 1.442695, %v825_v28  ;;  %v859_v22 = vmul.f32 1.442695, %v826_v43 }
 0x25b   : > { %v782_v4 = vpop.xlane.xlu1 %781  ;;  %1363 = vmax.xlane.f32.xlu1 %v1362_v13 }
 0x25c   : > { %2236 = vpow2.f32 %v857_v29  ;;  %v827_v31 = vsub.f32 %v2666_v35, %v782_v4  ;;  %v828_v30 = vsub.f32 %v2668_v36, %v782_v4 }
 0x25d   : > { %2238 = vpow2.f32 %v859_v22 }
 0x25e   : > { %v861_v40 = vmul.f32 1.442695, %v827_v31  ;;  %v863_v49 = vmul.f32 1.442695, %v828_v30 }
 0x25f   : > { %v785_v58 = vpop.xlane.xlu1 %784  ;;  %1369 = vmax.xlane.f32.xlu1 %v1368_v19 }
 0x260   : > { %2240 = vpow2.f32 %v861_v40  ;;  %v829_v63 = vsub.f32 %v2672_v38, %v785_v58  ;;  %v830_v32 = vsub.f32 %v2674_v39, %v785_v58 }
 0x261   : > { %2242 = vpow2.f32 %v863_v49 }
 0x262   : > { %v865_v33 = vmul.f32 1.442695, %v829_v63  ;;  %v867_v43 = vmul.f32 1.442695, %v830_v32 }
 0x263   : > { %v788_v7 = vpop.xlane.xlu1 %787  ;;  %1375 = vmax.xlane.f32.xlu1 %v1374_v25 }
 0x264   : > { %2244 = vpow2.f32 %v865_v33  ;;  %v831_v35 = vsub.f32 %v2678_v41, %v788_v7  ;;  %v832_v36 = vsub.f32 %v2680_v42, %v788_v7 }
 0x265   : > { %2246 = vpow2.f32 %v867_v43 }
 0x266   : > { %v2237_v29 = vpop.eup %2236  ;;  %v869_v30 = vmul.f32 1.442695, %v831_v35  ;;  %v871_v4 = vmul.f32 1.442695, %v832_v36 }
 0x267   : > { %v2239_v13 = vpop.eup %2238  ;;  %v791_v10 = vpop.xlane.xlu1 %790 }
 0x268   : > { %2248 = vpow2.f32 %v869_v30  ;;  %1033 = vmatprep.mubr.f32.mxu1 %v2239_v13  ;;  %v833_v38 = vsub.f32 %v2684_v44, %v791_v10  ;;  %v834_v39 = vsub.f32 %v2686_v45, %v791_v10  ;;  %v921_v19 = vadd.f32 %v2239_v13, %v2237_v29 }
 0x269   : > { %2250 = vpow2.f32 %v871_v4 }
 0x26a   : > { %v2241_v25 = vpop.eup %2240  ;;  %v873_v28 = vmul.f32 1.442695, %v833_v38  ;;  %v875_v22 = vmul.f32 1.442695, %v834_v39  ;;  %922 = vadd.xlane.f32.xlu0 %v921_v19 }
 0x26b   : > { %v2243_v41 = vpop.eup %2242  ;;  %v453_v42 = vpop.permute.xlu1 %452 }
 0x26c   : > { %v794_v31 = vpop.xlane.xlu0 %793  ;;  %2252 = vpow2.f32 %v873_v28  ;;  %v525_v40 = vadd.f32 %v2721_v62, %v453_v42  ;;  %v527_v49 = vadd.f32 %v2725_v1, %v453_v42  ;;  %v924_v45 = vadd.f32 %v2243_v41, %v2241_v25 }
 0x26d   : > { %v835_v58 = vsub.f32 %v2690_v47, %v794_v31  ;;  %2254 = vpow2.f32 %v875_v22  ;;  %v836_v44 = vsub.f32 %v2692_v48, %v794_v31 }
 0x26e   : > { %v2245_v63 = vpop.eup %2244  ;;  %v1524_v32 = vrot.slane %v527_v49, 4  ;;  %969 = vmatprep.subr.mxu1 %v527_v49  ;;  %925 = vadd.xlane.f32.xlu1 %v924_v45  ;;  %v1523_v62 = vrot.slane %v525_v40, 4 }
 0x26f   : > { %v877_v33 = vmul.f32 1.442695, %v835_v58  ;;  %v2247_v43 = vpop.eup %2246  ;;  %v879_v7 = vmul.f32 1.442695, %v836_v44  ;;  %970 = vmatpush1.xpose.msra.mxu1 %v525_v40 }
 0x270   : > { %1527 = vmatprep.subr.mxu1 %v1524_v32  ;;  %v927_v35 = vadd.f32 %v2247_v43, %v2245_v63 }
 0x271   : > { %2256 = vpow2.f32 %v877_v33 }
 0x272   : > { %2258 = vpow2.f32 %v879_v7  ;;  %v2249_v1 = vpop.eup %2248  ;;  %928 = vadd.xlane.f32.xlu0 %v927_v35  ;;  %1034 = vmatmul.mubr.f32.vlgmr.msra.gmra.mrb[2].mxu1 %v2237_v29 }
 0x273   : > { %v2251_v47 = vpop.eup %2250  ;;  %1038 = vmatprep.mubr.f32.mxu1 %v2243_v41  ;;  %1528 = vmatpush1.xpose.msra.mxu1 %v1523_v62 }
 0x274   : > { %v930_v48 = vadd.f32 %v2251_v47, %v2249_v1 }
 0x276   : > { %v2253_v36 = vpop.eup %2252  ;;  %931 = vadd.xlane.f32.xlu1 %v930_v48  ;;  %1039 = vmatmul.mubr.f32.gmra.mrb[4].mxu1 %v2241_v25 }
 0x277   : > { %v2255_v30 = vpop.eup %2254  ;;  %1043 = vmatprep.mubr.f32.mxu1 %v2247_v43 }
 0x278   : > { %v933_v4 = vadd.f32 %v2255_v30, %v2253_v36 }
 0x27a   : > { %934 = vadd.xlane.f32.xlu0 %v933_v4  ;;  %1044 = vmatmul.mubr.f32.gmra.mrb[6].mxu1 %v2245_v63 }
 0x27b   : > { %v2257_v13 = vpop.eup %2256  ;;  %1048 = vmatprep.mubr.f32.mxu1 %v2251_v47 }
 0x27c   : > { %v2259_v10 = vpop.eup %2258 }
 0x27d   : > { %v936_v38 = vadd.f32 %v2259_v10, %v2257_v13 }
 0x27e   : > { %1049 = vmatmul.mubr.f32.gmra.mrb[8].mxu1 %v2249_v1 }
 0x27f   : > { %937 = vadd.xlane.f32.xlu1 %v936_v38  ;;  %1053 = vmatprep.mubr.f32.mxu1 %v2255_v30 }
 0x282   : > { %1054 = vmatmul.mubr.f32.gmra.mrb[10].mxu1 %v2253_v36 }
 0x283   : > { %1058 = vmatprep.mubr.f32.mxu1 %v2259_v10 }
 0x286   : > { %1059 = vmatmul.mubr.f32.gmra.mrb[12].mxu1 %v2257_v13 }
 0x29c   : > { %v797_v29 = vpop.xlane.xlu1 %796 }
 0x29d   : > { %v837_v39 = vsub.f32 %v2696_v50, %v797_v29  ;;  %v838_v19 = vsub.f32 %v2698_v51, %v797_v29 }
 0x29f   : > { %v881_v25 = vmul.f32 1.442695, %v837_v39  ;;  %v883_v28 = vmul.f32 1.442695, %v838_v19 }
 0x2a0   : > { %v800_v22 = vpop.xlane.xlu1 %799 }
 0x2a1   : > { %2260 = vpow2.f32 %v881_v25  ;;  %v839_v41 = vsub.f32 %v2702_v53, %v800_v22  ;;  %v840_v42 = vsub.f32 %v2704_v54, %v800_v22 }
 0x2a2   : > { %2262 = vpow2.f32 %v883_v28 }
 0x2a3   : > { %v885_v31 = vmul.f32 1.442695, %v839_v41  ;;  %v887_v40 = vmul.f32 1.442695, %v840_v42 }
 0x2a4   : > { %v803_v49 = vpop.xlane.xlu1 %802 }
 0x2a5   : > { %2264 = vpow2.f32 %v885_v31  ;;  %v841_v58 = vsub.f32 %v2708_v56, %v803_v49  ;;  %v842_v44 = vsub.f32 %v2710_v57, %v803_v49 }
 0x2a6   : > { %2266 = vpow2.f32 %v887_v40 }
 0x2a7   : > { %v889_v50 = vmul.f32 1.442695, %v841_v58  ;;  %v891_v51 = vmul.f32 1.442695, %v842_v44 }
 0x2a8   : > { %v806_v45 = vpop.xlane.xlu1 %805 }
 0x2a9   : > { %2268 = vpow2.f32 %v889_v50  ;;  %v843_v63 = vsub.f32 %v2717_v60, %v806_v45  ;;  %v844_v53 = vsub.f32 %v2719_v61, %v806_v45 }
 0x2aa   : > { %2270 = vpow2.f32 %v891_v51 }
 0x2ab   : > { %v2261_v54 = vpop.eup %2260  ;;  %v893_v32 = vmul.f32 1.442695, %v843_v63  ;;  %v895_v33 = vmul.f32 1.442695, %v844_v53 }
 0x2ac   : > { %v2263_v43 = vpop.eup %2262  ;;  %v809_v7 = vpop.xlane.xlu1 %808 }
 0x2ad   : > { %2272 = vpow2.f32 %v893_v32  ;;  %v845_v56 = vsub.f32 %v2727_v2, %v809_v7  ;;  %v846_v57 = vsub.f32 %v2729_v3, %v809_v7  ;;  %1063 = vmatprep.mubr.f32.mxu1 %v2263_v43  ;;  %v939_v35 = vadd.f32 %v2263_v43, %v2261_v54 }
 0x2ae   : > { %2274 = vpow2.f32 %v895_v33  ;;  %1064 = vmatmul.mubr.f32.gmra.mrb[14].mxu1 %v2261_v54 }
 0x2af   : > { %v2265_v62 = vpop.eup %2264  ;;  %v897_v1 = vmul.f32 1.442695, %v845_v56  ;;  %v899_v60 = vmul.f32 1.442695, %v846_v57  ;;  %940 = vadd.xlane.f32.xlu0 %v939_v35 }
 0x2b0   : > { %v2267_v61 = vpop.eup %2266  ;;  %v812_v47 = vpop.xlane.xlu1 %811 }
 0x2b1   : > { %2276 = vpow2.f32 %v897_v1  ;;  %v847_v48 = vsub.f32 %v2733_v5, %v812_v47  ;;  %v848_v36 = vsub.f32 %v2735_v6, %v812_v47  ;;  %1068 = vmatprep.mubr.f32.mxu1 %v2267_v61  ;;  %v942_v30 = vadd.f32 %v2267_v61, %v2265_v62 }
 0x2b2   : > { %2278 = vpow2.f32 %v899_v60  ;;  %1069 = vmatmul.mubr.f32.gmra.mrb[16].mxu1 %v2265_v62 }
 0x2b3   : > { %v2269_v2 = vpop.eup %2268  ;;  %v901_v3 = vmul.f32 1.442695, %v847_v48  ;;  %v903_v4 = vmul.f32 1.442695, %v848_v36  ;;  %943 = vadd.xlane.f32.xlu1 %v942_v30 }
 0x2b4   : > { %v2271_v13 = vpop.eup %2270  ;;  %v815_v10 = vpop.xlane.xlu1 %814 }
 0x2b5   : > { %2280 = vpow2.f32 %v901_v3  ;;  %v849_v38 = vsub.f32 %v2739_v8, %v815_v10  ;;  %v850_v29 = vsub.f32 %v2741_v9, %v815_v10  ;;  %1073 = vmatprep.mubr.f32.mxu1 %v2271_v13  ;;  %v945_v39 = vadd.f32 %v2271_v13, %v2269_v2 }
 0x2b6   : > { %2282 = vpow2.f32 %v903_v4  ;;  %1074 = vmatmul.mubr.f32.gmra.mrb[18].mxu1 %v2269_v2 }
 0x2b7   : > { %v2273_v5 = vpop.eup %2272  ;;  %v905_v6 = vmul.f32 1.442695, %v849_v38  ;;  %v907_v19 = vmul.f32 1.442695, %v850_v29  ;;  %946 = vadd.xlane.f32.xlu1 %v945_v39  ;;  %v1355_v25 = vpop.xlane.xlu0 %1354 }
 0x2b8   : > { %v2275_v28 = vpop.eup %2274  ;;  %v1393_v22 = vsub.f32 %v2811_v37, %v1355_v25  ;;  %v1394_v41 = vsub.f32 %v2813_v46, %v1355_v25  ;;  %v818_v42 = vpop.xlane.xlu1 %817 }
 0x2b9   : > { %2284 = vpow2.f32 %v905_v6  ;;  %v851_v8 = vsub.f32 %v2745_v11, %v818_v42  ;;  %v852_v9 = vsub.f32 %v2747_v12, %v818_v42  ;;  %1078 = vmatprep.mubr.f32.mxu1 %v2275_v28  ;;  %v948_v31 = vadd.f32 %v2275_v28, %v2273_v5 }
 0x2ba   : > { %2286 = vpow2.f32 %v907_v19  ;;  %v1441_v40 = vmul.f32 1.442695, %v1393_v22  ;;  %v1443_v49 = vmul.f32 1.442695, %v1394_v41  ;;  %1079 = vmatmul.mubr.f32.gmra.mrb[20].mxu1 %v2273_v5 }
 0x2bb   : > { %v2277_v58 = vpop.eup %2276  ;;  %v909_v44 = vmul.f32 1.442695, %v851_v8  ;;  %v911_v50 = vmul.f32 1.442695, %v852_v9  ;;  %949 = vadd.xlane.f32.xlu0 %v948_v31 }
 0x2bc   : > { %v2279_v51 = vpop.eup %2278  ;;  %2288 = vpow2.f32 %v1441_v40  ;;  %v821_v37 = vpop.xlane.xlu1 %820 }
 0x2bd   : > { %2290 = vpow2.f32 %v1443_v49  ;;  %v853_v46 = vsub.f32 %v2751_v14, %v821_v37  ;;  %v854_v11 = vsub.f32 %v2753_v15, %v821_v37  ;;  %1083 = vmatprep.mubr.f32.mxu1 %v2279_v51  ;;  %v951_v12 = vadd.f32 %v2279_v51, %v2277_v58  ;;  %v3134_v49 = vld [vmem:[#allocation19_spill] sm:$0xff] }
 0x2be   : > { %2292 = vpow2.f32 %v909_v44  ;;  %1084 = vmatmul.mubr.f32.gmra.mrb[22].mxu1 %v2277_v58  ;;  %v3135_v44 = vld [vmem:[#allocation20_spill] sm:$0xff]  ;;  %v3136_v37 = vld [vmem:[#allocation3_spill] sm:$0xff] }
 0x2bf   : > { %v2281_v45 = vpop.eup %2280  ;;  %2294 = vpow2.f32 %v911_v50  ;;  %v913_v63 = vmul.f32 1.442695, %v853_v46  ;;  %v915_v53 = vmul.f32 1.442695, %v854_v11  ;;  %952 = vadd.xlane.f32.xlu1 %v951_v12  ;;  %v1361_v54 = vpop.xlane.xlu0 %1360  ;;  %v3137_v11 = vld [vmem:[#allocation4_spill] sm:$0xff] }
 0x2c0   : > { %v2283_v32 = vpop.eup %2282  ;;  %v1397_v33 = vsub.f32 %v2823_v52, %v1361_v54  ;;  %v1398_v43 = vsub.f32 %v2825_v0, %v1361_v54  ;;  %v824_v7 = vpop.xlane.xlu1 %823 }
 0x2c1   : > { %2296 = vpow2.f32 %v913_v63  ;;  %v855_v14 = vsub.f32 %v2757_v17, %v824_v7  ;;  %v856_v15 = vsub.f32 %v2759_v18, %v824_v7  ;;  %1088 = vmatprep.mubr.f32.mxu1 %v2283_v32  ;;  %v954_v56 = vadd.f32 %v2283_v32, %v2281_v45 }
 0x2c2   : > { %2298 = vpow2.f32 %v915_v53  ;;  %v1449_v57 = vmul.f32 1.442695, %v1397_v33  ;;  %v1451_v35 = vmul.f32 1.442695, %v1398_v43  ;;  %1089 = vmatmul.mubr.f32.gmra.mrb[24].mxu1 %v2281_v45 }
 0x2c3   : > { %v2285_v62 = vpop.eup %2284  ;;  %v917_v1 = vmul.f32 1.442695, %v855_v14  ;;  %v919_v60 = vmul.f32 1.442695, %v856_v15  ;;  %955 = vadd.xlane.f32.xlu0 %v954_v56  ;;  %v3138_v14 = vld [vmem:[#allocation5_spill] sm:$0xff]  ;;  %v3139_v56 = vld [vmem:[#allocation6_spill] sm:$0xff] }
 0x2c4   : > { %v2287_v61 = vpop.eup %2286  ;;  %2300 = vpow2.f32 %v1449_v57  ;;  %v1331_v52 = vpop.xlane.xlu1 %1330 }
 0x2c5   : > { %2302 = vpow2.f32 %v1451_v35  ;;  %v1377_v0 = vsub.f32 %v2763_v20, %v1331_v52  ;;  %v1378_v17 = vsub.f32 %v2765_v21, %v1331_v52  ;;  %1093 = vmatprep.mubr.f32.mxu1 %v2287_v61  ;;  %v957_v18 = vadd.f32 %v2287_v61, %v2285_v62 }
 0x2c6   : > { %v2899_v47 = vpop.eup %2288  ;;  %2304 = vpow2.f32 %v917_v1  ;;  %1094 = vmatmul.mubr.f32.gmra.mrb[26].mxu1 %v2285_v62 }
 0x2c7   : > { %v2901_v48 = vpop.eup %2290  ;;  %2306 = vpow2.f32 %v919_v60  ;;  %v1409_v36 = vmul.f32 1.442695, %v1377_v0  ;;  %v1411_v30 = vmul.f32 1.442695, %v1378_v17  ;;  %958 = vadd.xlane.f32.xlu1 %v957_v18  ;;  %v1367_v2 = vpop.xlane.xlu0 %1366 }
 0x2c8   : > { %v2293_v3 = vpop.eup %2292  ;;  %v1401_v4 = vsub.f32 %v2835_v34, %v1367_v2  ;;  %v1402_v20 = vsub.f32 %v2837_v55, %v1367_v2  ;;  %v1334_v13 = vpop.xlane.xlu1 %1333  ;;  %v2907_v21 = vadd.f32 %v2901_v48, %v2899_v47  ;;  %v3141_v2 = vld [vmem:[#allocation8_spill] sm:$0xff] }
 0x2c9   : > { %v2295_v10 = vpop.eup %2294  ;;  %2308 = vpow2.f32 %v1409_v36  ;;  %v1379_v38 = vsub.f32 %v2769_v23, %v1334_v13  ;;  %v1380_v29 = vsub.f32 %v2771_v24, %v1334_v13  ;;  %v3140_v36 = vld [vmem:[#allocation7_spill] sm:$0xff] }
 0x2ca   : > { %2310 = vpow2.f32 %v1411_v30  ;;  %v1457_v39 = vmul.f32 1.442695, %v1401_v4  ;;  %v1459_v5 = vmul.f32 1.442695, %v1402_v20  ;;  %1098 = vmatprep.mubr.f32.mxu1 %v2295_v10  ;;  %v960_v6 = vadd.f32 %v2295_v10, %v2293_v3 }
 0x2cb   : > { %v2297_v19 = vpop.eup %2296  ;;  %v1413_v34 = vmul.f32 1.442695, %v1379_v38  ;;  %v1415_v25 = vmul.f32 1.442695, %v1380_v29  ;;  %1099 = vmatmul.mubr.f32.gmra.mrb[28].mxu1 %v2293_v3 }
 0x2cc   : > { %v2299_v55 = vpop.eup %2298  ;;  %2312 = vpow2.f32 %v1457_v39  ;;  %961 = vadd.xlane.f32.xlu0 %v960_v6  ;;  %v1337_v28 = vpop.xlane.xlu1 %1336  ;;  %v3142_v39 = vld [vmem:[#allocation9_spill] sm:$0xff]  ;;  %v3143_v6 = vld [vmem:[#allocation10_spill] sm:$0xff] }
 0x2cd   : > { %2314 = vpow2.f32 %v1459_v5  ;;  %v1381_v22 = vsub.f32 %v2775_v26, %v1337_v28  ;;  %v1382_v23 = vsub.f32 %v2777_v27, %v1337_v28  ;;  %1103 = vmatprep.mubr.f32.mxu1 %v2299_v55  ;;  %v2913_v24 = vadd.f32 %v2299_v55, %v2297_v19 }
 0x2ce   : > { %v2915_v41 = vpop.eup %2300  ;;  %2316 = vpow2.f32 %v1413_v34 }
 0x2cf   : > { %v2917_v42 = vpop.eup %2302  ;;  %2318 = vpow2.f32 %v1415_v25  ;;  %v1417_v8 = vmul.f32 1.442695, %v1381_v22  ;;  %v1419_v9 = vmul.f32 1.442695, %v1382_v23  ;;  %1104 = vmatmul.mubr.f32.gmra.mrb[30].mxu1 %v2297_v19  ;;  %v1373_v31 = vpop.xlane.xlu0 %1372 }
 0x2d0   : > { %v2305_v40 = vpop.eup %2304  ;;  %v1405_v58 = vsub.f32 %v3134_v49, %v1373_v31  ;;  %v1406_v26 = vsub.f32 %v3135_v44, %v1373_v31  ;;  %v1340_v50 = vpop.xlane.xlu1 %1339  ;;  %v2923_v27 = vadd.f32 %v2917_v42, %v2915_v41 }
 0x2d1   : > { %v2307_v51 = vpop.eup %2306  ;;  %2320 = vpow2.f32 %v1417_v8  ;;  %v1383_v46 = vsub.f32 %v3136_v37, %v1340_v50  ;;  %v1384_v12 = vsub.f32 %v3137_v11, %v1340_v50 }
 0x2d2   : > { %2322 = vpow2.f32 %v1419_v9  ;;  %v1465_v45 = vmul.f32 1.442695, %v1405_v58  ;;  %v1467_v63 = vmul.f32 1.442695, %v1406_v26  ;;  %1108 = vmatprep.mubr.f32.mxu1 %v2307_v51  ;;  %v2927_v53 = vadd.f32 %v2307_v51, %v2305_v40  ;;  %v3145_v58 = vld [vmem:[#allocation12_spill] sm:$0xff] }
 0x2d3   : > { %v2309_v54 = vpop.eup %2308  ;;  %v1421_v32 = vmul.f32 1.442695, %v1383_v46  ;;  %v1423_v33 = vmul.f32 1.442695, %v1384_v12  ;;  %1109 = vmatmul.mubr.f32.gmra.mrb[32].mxu1 %v2305_v40  ;;  %v3144_v40 = vld [vmem:[#allocation11_spill] sm:$0xff]  ;;  %v3146_v12 = vld [vmem:[#allocation13_spill] sm:$0xff] }
 0x2d4   : > { %v2311_v43 = vpop.eup %2310  ;;  %2324 = vpow2.f32 %v1465_v45  ;;  %v1343_v7 = vpop.xlane.xlu1 %1342 }
 0x2d5   : > { %2326 = vpow2.f32 %v1467_v63  ;;  %v1385_v15 = vsub.f32 %v3138_v14, %v1343_v7  ;;  %v1386_v57 = vsub.f32 %v3139_v56, %v1343_v7  ;;  %1591 = vmatprep.mubr.f32.mxu1 %v2311_v43  ;;  %v1473_v35 = vadd.f32 %v2311_v43, %v2309_v54  ;;  %v3147_v63 = vld [vmem:[#allocation14_spill] sm:$0xff]  ;;  %v3148_v56 = vld [vmem:[#allocation15_spill] sm:$0xff] }
 0x2d6   : > { %v2931_v62 = vpop.eup %2312  ;;  %2328 = vpow2.f32 %v1421_v32 }
 0x2d7   : > { %v2933_v1 = vpop.eup %2314  ;;  %2330 = vpow2.f32 %v1423_v33  ;;  %v1425_v60 = vmul.f32 1.442695, %v1385_v15  ;;  %v1427_v61 = vmul.f32 1.442695, %v1386_v57  ;;  %1592 = vmatmul.mubr.f32.vlgmr.msra.gmra.mrb[34].mxu1 %v2309_v54  ;;  %1474 = vadd.xlane.f32.xlu0 %v1473_v35  ;;  %v3149_v35 = vld [vmem:[#allocation16_spill] sm:$0xff] }
 0x2d8   : > { %v2317_v52 = vpop.eup %2316  ;;  %v1346_v0 = vpop.xlane.xlu1 %1345  ;;  %v2937_v17 = vadd.f32 %v2933_v1, %v2931_v62 }
 0x2d9   : > { %v2319_v18 = vpop.eup %2318  ;;  %2332 = vpow2.f32 %v1425_v60  ;;  %v1387_v30 = vsub.f32 %v3140_v36, %v1346_v0  ;;  %v1388_v3 = vsub.f32 %v3141_v2, %v1346_v0  ;;  %v3150_v2 = vld [vmem:[#allocation17_spill] sm:$0xff] }
 0x2da   : > { %2334 = vpow2.f32 %v1427_v61  ;;  %1596 = vmatprep.mubr.f32.mxu1 %v2319_v18  ;;  %v1476_v4 = vadd.f32 %v2319_v18, %v2317_v52 }
 0x2db   : > { %v2321_v20 = vpop.eup %2320  ;;  %v1429_v13 = vmul.f32 1.442695, %v1387_v30  ;;  %v1431_v10 = vmul.f32 1.442695, %v1388_v3  ;;  %1597 = vmatmul.mubr.f32.gmra.mrb[36].mxu1 %v2317_v52 }
 0x2dc   : > { %v2323_v38 = vpop.eup %2322  ;;  %1477 = vadd.xlane.f32.xlu1 %v1476_v4  ;;  %v1349_v29 = vpop.xlane.xlu1 %1348  ;;  %v3151_v4 = vld [vmem:[#allocation18_spill] sm:$0xff] }
 0x2dd   : > { %2336 = vpow2.f32 %v1429_v13  ;;  %v1389_v5 = vsub.f32 %v3142_v39, %v1349_v29  ;;  %v1390_v19 = vsub.f32 %v3143_v6, %v1349_v29  ;;  %1601 = vmatprep.mubr.f32.mxu1 %v2323_v38  ;;  %v1479_v34 = vadd.f32 %v2323_v38, %v2321_v20 }
 0x2de   : > { %v2943_v25 = vpop.eup %2324  ;;  %2338 = vpow2.f32 %v1431_v10 }
 0x2df   : > { %v2945_v55 = vpop.eup %2326  ;;  %v1433_v28 = vmul.f32 1.442695, %v1389_v5  ;;  %v1435_v22 = vmul.f32 1.442695, %v1390_v19  ;;  %1602 = vmatmul.mubr.f32.gmra.mrb[38].mxu1 %v2321_v20  ;;  %1480 = vadd.xlane.f32.xlu0 %v1479_v34 }
 0x2e0   : > { %v2329_v23 = vpop.eup %2328  ;;  %v1352_v8 = vpop.xlane.xlu1 %1351  ;;  %v2949_v9 = vadd.f32 %v2945_v55, %v2943_v25 }
 0x2e1   : > { %v2331_v31 = vpop.eup %2330  ;;  %2340 = vpow2.f32 %v1433_v28  ;;  %v1391_v49 = vsub.f32 %v3144_v40, %v1352_v8  ;;  %v1392_v44 = vsub.f32 %v3145_v58, %v1352_v8 }
 0x2e2   : > { %2342 = vpow2.f32 %v1435_v22  ;;  %1606 = vmatprep.mubr.f32.mxu1 %v2331_v31  ;;  %v1482_v26 = vadd.f32 %v2331_v31, %v2329_v23 }
 0x2e3   : > { %v2333_v50 = vpop.eup %2332  ;;  %v1437_v51 = vmul.f32 1.442695, %v1391_v49  ;;  %v1439_v37 = vmul.f32 1.442695, %v1392_v44  ;;  %1607 = vmatmul.mubr.f32.gmra.mrb[40].mxu1 %v2329_v23 }
 0x2e4   : > { %v2335_v46 = vpop.eup %2334  ;;  %1483 = vadd.xlane.f32.xlu1 %v1482_v26  ;;  %v1358_v11 = vpop.xlane.xlu1 %1357 }
 0x2e5   : > { %2344 = vpow2.f32 %v1437_v51  ;;  %v1395_v45 = vsub.f32 %v3146_v12, %v1358_v11  ;;  %v1396_v54 = vsub.f32 %v3147_v63, %v1358_v11  ;;  %1611 = vmatprep.mubr.f32.mxu1 %v2335_v46  ;;  %v1485_v32 = vadd.f32 %v2335_v46, %v2333_v50 }
 0x2e6   : > { %2346 = vpow2.f32 %v1439_v37 }
 0x2e7   : > { %v2337_v33 = vpop.eup %2336  ;;  %v1445_v43 = vmul.f32 1.442695, %v1395_v45  ;;  %v1447_v7 = vmul.f32 1.442695, %v1396_v54  ;;  %1612 = vmatmul.mubr.f32.gmra.mrb[42].mxu1 %v2333_v50  ;;  %1486 = vadd.xlane.f32.xlu0 %v1485_v32 }
 0x2e8   : > { %v2339_v14 = vpop.eup %2338  ;;  %v1364_v15 = vpop.xlane.xlu1 %1363 }
 0x2e9   : > { %2348 = vpow2.f32 %v1445_v43  ;;  %v1399_v57 = vsub.f32 %v3148_v56, %v1364_v15  ;;  %v1400_v60 = vsub.f32 %v3149_v35, %v1364_v15  ;;  %1616 = vmatprep.mubr.f32.mxu1 %v2339_v14  ;;  %v1488_v61 = vadd.f32 %v2339_v14, %v2337_v33 }
 0x2ea   : > { %2350 = vpow2.f32 %v1447_v7 }
 0x2eb   : > { %v2341_v52 = vpop.eup %2340  ;;  %v1453_v0 = vmul.f32 1.442695, %v1399_v57  ;;  %v1455_v18 = vmul.f32 1.442695, %v1400_v60  ;;  %1617 = vmatmul.mubr.f32.gmra.mrb[44].mxu1 %v2337_v33  ;;  %1489 = vadd.xlane.f32.xlu1 %v1488_v61 }
 0x2ec   : > { %v2343_v36 = vpop.eup %2342  ;;  %v1370_v30 = vpop.xlane.xlu1 %1369 }
 0x2ed   : > { %2352 = vpow2.f32 %v1453_v0  ;;  %v1403_v3 = vsub.f32 %v3150_v2, %v1370_v30  ;;  %v1404_v20 = vsub.f32 %v3151_v4, %v1370_v30  ;;  %1621 = vmatprep.mubr.f32.mxu1 %v2343_v36  ;;  %v1491_v13 = vadd.f32 %v2343_v36, %v2341_v52 }
 0x2ee   : > { %2354 = vpow2.f32 %v1455_v18 }
 0x2ef   : > { %v2345_v10 = vpop.eup %2344  ;;  %v1461_v38 = vmul.f32 1.442695, %v1403_v3  ;;  %v1463_v29 = vmul.f32 1.442695, %v1404_v20  ;;  %1622 = vmatmul.mubr.f32.gmra.mrb[46].mxu1 %v2341_v52  ;;  %1492 = vadd.xlane.f32.xlu0 %v1491_v13 }
 0x2f0   : > { %v2347_v39 = vpop.eup %2346  ;;  %v1376_v5 = vpop.xlane.xlu1 %1375 }
 0x2f1   : > { %2356 = vpow2.f32 %v1461_v38  ;;  %v1407_v6 = vsub.f32 %v2853_v59, %v1376_v5  ;;  %v1408_v19 = vsub.f32 %v2855_v16, %v1376_v5  ;;  %1626 = vmatprep.mubr.f32.mxu1 %v2347_v39  ;;  %v1494_v34 = vadd.f32 %v2347_v39, %v2345_v10 }
 0x2f2   : > { %2358 = vpow2.f32 %v1463_v29 }
 0x2f3   : > { %v2349_v28 = vpop.eup %2348  ;;  %v1469_v22 = vmul.f32 1.442695, %v1407_v6  ;;  %v1471_v23 = vmul.f32 1.442695, %v1408_v19  ;;  %1627 = vmatmul.mubr.f32.gmra.mrb[48].mxu1 %v2345_v10  ;;  %1495 = vadd.xlane.f32.xlu1 %v1494_v34 }
 0x2f4   : > { %v2351_v8 = vpop.eup %2350  ;;  %1631 = vmatprep.mubr.f32.mxu1 %v2901_v48  ;;  %1498 = vadd.xlane.f32.xlu0 %v2907_v21 }
 0x2f5   : > { %2360 = vpow2.f32 %v1469_v22  ;;  %v1500_v31 = vadd.f32 %v2351_v8, %v2349_v28 }
 0x2f6   : > { %2362 = vpow2.f32 %v1471_v23 }
 0x2f7   : > { %v2353_v40 = vpop.eup %2352  ;;  %1632 = vmatmul.mubr.f32.gmra.mrb[50].mxu1 %v2899_v47  ;;  %1501 = vadd.xlane.f32.xlu1 %v1500_v31 }
 0x2f8   : > { %v2355_v59 = vpop.eup %2354  ;;  %1636 = vmatprep.mubr.f32.mxu1 %v2351_v8  ;;  %1504 = vadd.xlane.f32.xlu0 %v2923_v27 }
 0x2f9   : > { %v1506_v16 = vadd.f32 %v2355_v59, %v2353_v40 }
 0x2fb   : > { %v2357_v49 = vpop.eup %2356  ;;  %1637 = vmatmul.mubr.f32.gmra.mrb[52].mxu1 %v2349_v28  ;;  %1507 = vadd.xlane.f32.xlu1 %v1506_v16 }
 0x2fc   : > { %v2359_v58 = vpop.eup %2358  ;;  %1641 = vmatprep.mubr.f32.mxu1 %v2917_v42  ;;  %1510 = vadd.xlane.f32.xlu0 %v2937_v17  ;;  %v926_v42 = vpop.xlane.xlu1 %925 }
 0x2fd   : > { %v1512_v48 = vadd.f32 %v2359_v58, %v2357_v49 }
 0x2ff   : > { %v2361_v21 = vpop.eup %2360  ;;  %1642 = vmatmul.mubr.f32.gmra.mrb[54].mxu1 %v2915_v41  ;;  %1513 = vadd.xlane.f32.xlu1 %v1512_v48  ;;  %v923_v41 = vpop.xlane.xlu0 %922 }
 0x300   : > { %v2363_v47 = vpop.eup %2362  ;;  %1646 = vmatprep.mubr.f32.mxu1 %v2355_v59  ;;  %1516 = vadd.xlane.f32.xlu0 %v2949_v9  ;;  %2364 = vrcp.f32 %v923_v41 }
 0x301   : > { %v1518_v44 = vadd.f32 %v2363_v47, %v2361_v21  ;;  %2366 = vrcp.f32 %v926_v42 }
 0x303   : > { %1647 = vmatmul.mubr.f32.gmra.mrb[56].mxu1 %v2353_v40  ;;  %1519 = vadd.xlane.f32.xlu1 %v1518_v44  ;;  %v929_v27 = vpop.xlane.xlu0 %928  ;;  %v932_v17 = vpop.xlane.xlu1 %931 }
 0x304   : > { %1651 = vmatprep.mubr.f32.mxu1 %v2933_v1  ;;  %2368 = vrcp.f32 %v929_v27 }
 0x305   : > { %2370 = vrcp.f32 %v932_v17 }
 0x307   : > { %1652 = vmatmul.mubr.f32.gmra.mrb[58].mxu1 %v2931_v62  ;;  %v935_v62 = vpop.xlane.xlu0 %934 }
 0x308   : > { %1656 = vmatprep.mubr.f32.mxu1 %v2359_v58  ;;  %2372 = vrcp.f32 %v935_v62 }
 0x30a   : > { %v2365_v9 = vpop.eup %2364 }
 0x30b   : > { %1657 = vmatmul.mubr.f32.gmra.mrb[60].mxu1 %v2357_v49 }
 0x30c   : > { %1661 = vmatprep.mubr.f32.mxu1 %v2945_v55  ;;  %v2367_v55 = vpop.eup %2366  ;;  %v938_v46 = vpop.xlane.xlu1 %937 }
 0x30d   : > { %2374 = vrcp.f32 %v938_v46 }
 0x30e   : > { %v2369_v11 = vpop.eup %2368 }
 0x30f   : > { %1662 = vmatmul.mubr.f32.gmra.mrb[62].mxu1 %v2943_v25  ;;  %v2371_v54 = vpop.eup %2370 }
 0x310   : > { %1666 = vmatprep.mubr.f32.mxu1 %v2363_v47 }
 0x312   : > { %v2373_v7 = vpop.eup %2372 }
 0x313   : > { %1667 = vmatmul.mubr.f32.gmra.mrb[64].mxu1 %v2361_v21 }
 0x317   : > { %v2375_v57 = vpop.eup %2374 }
 0x33c   : > { %v941_v52 = vpop.xlane.xlu0 %940 }
 0x33d   : > { %2376 = vrcp.f32 %v941_v52 }
 0x340   : > { %v944_v0 = vpop.xlane.xlu1 %943 }
 0x341   : > { %2378 = vrcp.f32 %v944_v0 }
 0x344   : > { %v947_v18 = vpop.xlane.xlu1 %946 }
 0x345   : > { %v1035_v26 = vpop.f32.mrb[2].mxu1  ;;  %2380 = vrcp.f32 %v947_v18 }
 0x346   : > { %v1130_v1 = vmul.f32 %v2365_v9, %v1035_v26  ;;  %v1037_v50 = vpop.f32.mrb[3].mxu1 }
 0x347   : > { %v2377_v30 = vpop.eup %2376 }
 0x348   : > { %1146 = vst.msk [vmem:[#allocation2] sm:$0xff] %vm368_vm1, %v1130_v1  ;;  %v950_v36 = vpop.xlane.xlu0 %949 }
 0x349   : > { %v1040_v51 = vpop.f32.mrb[4].mxu1  ;;  %2382 = vrcp.f32 %v950_v36 }
 0x34a   : > { %v1131_v25 = vmul.f32 %v2367_v55, %v1040_v51  ;;  %v1042_v37 = vpop.f32.mrb[5].mxu1 }
 0x34b   : > { %v2379_v13 = vpop.eup %2378 }
 0x34c   : > { %1147 = vst.msk [vmem:[#allocation2 + $0x8] sm:$0xff] %vm368_vm1, %v1131_v25  ;;  %v953_v20 = vpop.xlane.xlu1 %952 }
 0x34d   : > { %v1045_v12 = vpop.f32.mrb[6].mxu1  ;;  %2384 = vrcp.f32 %v953_v20 }
 0x34e   : > { %v1132_v45 = vmul.f32 %v2369_v11, %v1045_v12  ;;  %v1047_v63 = vpop.f32.mrb[7].mxu1 }
 0x34f   : > { %v2381_v5 = vpop.eup %2380 }
 0x350   : > { %1148 = vst.msk [vmem:[#allocation2 + $0x10] sm:$0xff] %vm368_vm1, %v1132_v45  ;;  %v956_v39 = vpop.xlane.xlu0 %955 }
 0x351   : > { %v1050_v32 = vpop.f32.mrb[8].mxu1  ;;  %2386 = vrcp.f32 %v956_v39 }
 0x352   : > { %v1133_v33 = vmul.f32 %v2371_v54, %v1050_v32  ;;  %v1052_v43 = vpop.f32.mrb[9].mxu1 }
 0x353   : > { %v2383_v22 = vpop.eup %2382  ;;  %v2472_v43 = vmov 0.0|0.0  }
 0x354   : > { %1149 = vst.msk [vmem:[#allocation2 + $0x18] sm:$0xff] %vm368_vm1, %v1133_v33  ;;  %v959_v28 = vpop.xlane.xlu1 %958  ;;  %2156 = vmatprep.subr.bf16.mxu0 %v2472_v43 }
 0x355   : > { %v1055_v14 = vpop.f32.mrb[10].mxu1  ;;  %2388 = vrcp.f32 %v959_v28 }
 0x356   : > { %v1134_v15 = vmul.f32 %v2373_v7, %v1055_v14  ;;  %v1057_v56 = vpop.f32.mrb[11].mxu1 }
 0x357   : > { %v2385_v40 = vpop.eup %2384 }
 0x358   : > { %1150 = vst.msk [vmem:[#allocation2 + $0x20] sm:$0xff] %vm368_vm1, %v1134_v15 }
 0x359   : > { %v1060_v35 = vpop.f32.mrb[12].mxu1  ;;  %v962_v59 = vpop.xlane.xlu0 %961 }
 0x35a   : > { %v1135_v60 = vmul.f32 %v2375_v57, %v1060_v35  ;;  %v1062_v61 = vpop.f32.mrb[13].mxu1  ;;  %2390 = vrcp.f32 %v962_v59 }
 0x35b   : > { %v2387_v48 = vpop.eup %2386 }
 0x35c   : > { %1151 = vst.msk [vmem:[#allocation2 + $0x28] sm:$0xff] %vm368_vm1, %v1135_v60 }
 0x35f   : > { %v2389_v41 = vpop.eup %2388 }
 0x364   : > { %v1475_v9 = vpop.xlane.xlu0 %1474  ;;  %v2391_v26 = vpop.eup %2390 }
 0x365   : > { %2392 = vrcp.f32 %v1475_v9 }
 0x369   : > { %v1478_v55 = vpop.xlane.xlu1 %1477 }
 0x36a   : > { %2394 = vrcp.f32 %v1478_v55 }
 0x36c   : > { %v1481_v37 = vpop.xlane.xlu0 %1480 }
 0x36d   : > { %2396 = vrcp.f32 %v1481_v37 }
 0x36f   : > { %v2393_v45 = vpop.eup %2392 }
 0x371   : > { %v1484_v12 = vpop.xlane.xlu1 %1483 }
 0x372   : > { %2398 = vrcp.f32 %v1484_v12 }
 0x374   : > { %v1487_v33 = vpop.xlane.xlu0 %1486  ;;  %v2395_v7 = vpop.eup %2394 }
 0x375   : > { %2400 = vrcp.f32 %v1487_v33 }
 0x377   : > { %v2397_v35 = vpop.eup %2396 }
 0x378   : > { %v1490_v57 = vpop.xlane.xlu1 %1489 }
 0x379   : > { %2402 = vrcp.f32 %v1490_v57 }
 0x37c   : > { %v1493_v0 = vpop.xlane.xlu0 %1492  ;;  %v2399_v18 = vpop.eup %2398 }
 0x37d   : > { %2404 = vrcp.f32 %v1493_v0 }
 0x381   : > { %v1065_v2 = vpop.f32.mrb[14].mxu1 }
 0x382   : > { %v1136_v3 = vmul.f32 %v2377_v30, %v1065_v2  ;;  %v1067_v4 = vpop.f32.mrb[15].mxu1 }
 0x383   : > { %v2401_v4 = vpop.eup %2400 }
 0x384   : > { %1152 = vst.msk [vmem:[#allocation2 + $0x30] sm:$0xff] %vm368_vm1, %v1136_v3  ;;  %v1496_v3 = vpop.xlane.xlu1 %1495 }
 0x385   : > { %v1070_v10 = vpop.f32.mrb[16].mxu1  ;;  %2406 = vrcp.f32 %v1496_v3 }
 0x386   : > { %v1137_v38 = vmul.f32 %v2379_v13, %v1070_v10  ;;  %v1072_v29 = vpop.f32.mrb[17].mxu1 }
 0x388   : > { %1153 = vst.msk [vmem:[#allocation2 + $0x38] sm:$0xff] %vm368_vm1, %v1137_v38  ;;  %v2403_v38 = vpop.eup %2402 }
 0x389   : > { %v1075_v6 = vpop.f32.mrb[18].mxu1 }
 0x38a   : > { %v1138_v19 = vmul.f32 %v2381_v5, %v1075_v6  ;;  %v1077_v34 = vpop.f32.mrb[19].mxu1  ;;  %v2405_v6 = vpop.eup %2404 }
 0x38c   : > { %1154 = vst.msk [vmem:[#allocation2 + $0x40] sm:$0xff] %vm368_vm1, %v1138_v19 }
 0x38d   : > { %v1080_v23 = vpop.f32.mrb[20].mxu1 }
 0x38e   : > { %v1139_v8 = vmul.f32 %v2383_v22, %v1080_v23  ;;  %v1082_v31 = vpop.f32.mrb[21].mxu1 }
 0x38f   : > { %v2407_v22 = vpop.eup %2406 }
 0x390   : > { %1155 = vst.msk [vmem:[#allocation2 + $0x48] sm:$0xff] %vm368_vm1, %v1139_v8 }
 0x391   : > { %v1085_v16 = vpop.f32.mrb[22].mxu1 }
 0x392   : > { %v1140_v49 = vmul.f32 %v2385_v40, %v1085_v16  ;;  %v1087_v58 = vpop.f32.mrb[23].mxu1 }
 0x394   : > { %1156 = vst.msk [vmem:[#allocation2 + $0x50] sm:$0xff] %vm368_vm1, %v1140_v49 }
 0x395   : > { %v1090_v21 = vpop.f32.mrb[24].mxu1 }
 0x396   : > { %v1141_v47 = vmul.f32 %v2387_v48, %v1090_v21  ;;  %v1092_v44 = vpop.f32.mrb[25].mxu1 }
 0x398   : > { %1157 = vst.msk [vmem:[#allocation2 + $0x58] sm:$0xff] %vm368_vm1, %v1141_v47 }
 0x399   : > { %v1095_v42 = vpop.f32.mrb[26].mxu1 }
 0x39a   : > { %v1142_v27 = vmul.f32 %v2389_v41, %v1095_v42  ;;  %v1097_v17 = vpop.f32.mrb[27].mxu1 }
 0x39c   : > { %1158 = vst.msk [vmem:[#allocation2 + $0x60] sm:$0xff] %vm368_vm1, %v1142_v27 }
 0x39e   : > { %v1100_v1 = vpop.f32.mrb[28].mxu1 }
 0x39f   : > { %v1143_v50 = vmul.f32 %v2391_v26, %v1100_v1  ;;  %v1102_v62 = vpop.f32.mrb[29].mxu1  ;;  %v1502_v26 = vpop.xlane.xlu1 %1501 }
 0x3a0   : > { %v1499_v62 = vpop.xlane.xlu0 %1498 }
 0x3a1   : > { %1159 = vst.msk [vmem:[#allocation2 + $0x68] sm:$0xff] %vm368_vm1, %v1143_v50  ;;  %2408 = vrcp.f32 %v1499_v62 }
 0x3a2   : > { %v2987_v51 = vpop.f32.mrb[30].mxu1  ;;  %2410 = vrcp.f32 %v1502_v26 }
 0x3a3   : > { %v1107_v25 = vpop.f32.mrb[31].mxu1  ;;  %v1508_v55 = vpop.xlane.xlu1 %1507 }
 0x3a4   : > { %v1505_v25 = vpop.xlane.xlu0 %1504  ;;  %2412 = vrcp.f32 %v1508_v55 }
 0x3a5   : > { %2414 = vrcp.f32 %v1505_v25 }
 0x3a6   : > { %v2989_v46 = vpop.f32.mrb[32].mxu1 }
 0x3a7   : > { %v1112_v11 = vpop.f32.mrb[33].mxu1  ;;  %v1514_v37 = vpop.xlane.xlu1 %1513 }
 0x3a8   : > { %v1511_v11 = vpop.xlane.xlu0 %1510  ;;  %2416 = vrcp.f32 %v1514_v37 }
 0x3a9   : > { %2418 = vrcp.f32 %v1511_v11 }
 0x3aa   : > { %v1593_v63 = vpop.f32.mrb[34].mxu1 }
 0x3ab   : > { %v1688_v54 = vmul.f32 %v2393_v45, %v1593_v63  ;;  %v1595_v32 = vpop.f32.mrb[35].mxu1  ;;  %v1520_v12 = vpop.xlane.xlu1 %1519 }
 0x3ac   : > { %v2409_v45 = vpop.eup %2408  ;;  %2420 = vrcp.f32 %v1520_v12 }
 0x3ad   : > { %1720 = vrot.lane.b32.xlu0 %v1688_v54, %s2471_s13  ;;  %v1517_v54 = vpop.xlane.xlu0 %1516 }
 0x3ae   : > { %v1598_v14 = vpop.f32.mrb[36].mxu1  ;;  %2422 = vrcp.f32 %v1517_v54  ;;  %v1785_v54 = vld [vmem:[%s3094_s6] sm:$0xf] }
 0x3af   : > { %v1689_v15 = vmul.f32 %v2395_v7, %v1598_v14  ;;  %v1600_v56 = vpop.f32.mrb[37].mxu1 }
 0x3b1   : > { %1722 = vrot.lane.b32.xlu1 %v1689_v15, %s2471_s13 }
 0x3b2   : > { %v1603_v60 = vpop.f32.mrb[38].mxu1 }
 0x3b3   : > { %v1690_v61 = vmul.f32 %v2397_v35, %v1603_v60  ;;  %v1605_v52 = vpop.f32.mrb[39].mxu1 }
 0x3b5   : > { %1724 = vrot.lane.b32.xlu0 %v1690_v61, %s2471_s13 }
 0x3b6   : > { %v1608_v36 = vpop.f32.mrb[40].mxu1 }
 0x3b7   : > { %v1691_v30 = vmul.f32 %v2399_v18, %v1608_v36  ;;  %v1610_v2 = vpop.f32.mrb[41].mxu1  ;;  %v1925_v18 = vld [vmem:[%s3095_s7] sm:$0xf] }
 0x3b9   : > { %1726 = vrot.lane.b32.xlu1 %v1691_v30, %s2471_s13  ;;  %v3152_v30 = vmov 0.0  }
 0x3ba   : > { %v1613_v20 = vpop.f32.mrb[42].mxu1  ;;  %2153 = vmatprep.mubr.msk.f32.mxu0 %vm2473_vm3, %v3152_v30 }
 0x3bb   : > { %v1692_v13 = vmul.f32 %v2401_v4, %v1613_v20  ;;  %v1615_v10 = vpop.f32.mrb[43].mxu1 }
 0x3bd   : > { %1728 = vrot.lane.b32.xlu0 %v1692_v13, %s2471_s13 }
 0x3be   : > { %v1618_v29 = vpop.f32.mrb[44].mxu1 }
 0x3bf   : > { %v1693_v39 = vmul.f32 %v2403_v38, %v1618_v29  ;;  %v1620_v5 = vpop.f32.mrb[45].mxu1 }
 0x3c1   : > { %1730 = vrot.lane.b32.xlu1 %v1693_v39, %s2471_s13 }
 0x3c2   : > { %v1623_v19 = vpop.f32.mrb[46].mxu1 }
 0x3c3   : > { %v1694_v34 = vmul.f32 %v2405_v6, %v1623_v19  ;;  %v1625_v28 = vpop.f32.mrb[47].mxu1 }
 0x3c5   : > { %1732 = vrot.lane.b32.xlu0 %v1694_v34, %s2471_s13 }
 0x3c6   : > { %v1628_v23 = vpop.f32.mrb[48].mxu1 }
 0x3c7   : > { %v1695_v8 = vmul.f32 %v2407_v22, %v1628_v23  ;;  %v1630_v31 = vpop.f32.mrb[49].mxu1 }
 0x3c9   : > { %1734 = vrot.lane.b32.xlu1 %v1695_v8, %s2471_s13 }
 0x3ca   : > { %v1633_v40 = vpop.f32.mrb[50].mxu1 }
 0x3cb   : > { %v1635_v59 = vpop.f32.mrb[51].mxu1  ;;  %v1696_v63 = vmul.f32 %v2409_v45, %v1633_v40 }
 0x3ce   : > { %v1638_v16 = vpop.f32.mrb[52].mxu1 }
 0x3cf   : > { %v1640_v49 = vpop.f32.mrb[53].mxu1 }
 0x3d2   : > { %v1643_v58 = vpop.f32.mrb[54].mxu1 }
 0x3d3   : > { %v1645_v48 = vpop.f32.mrb[55].mxu1 }
 0x3d6   : > { %v1648_v21 = vpop.f32.mrb[56].mxu1 }
 0x3d7   : > { %v1650_v47 = vpop.f32.mrb[57].mxu1 }
 0x3da   : > { %v1653_v44 = vpop.f32.mrb[58].mxu1 }
 0x3db   : > { %v1655_v41 = vpop.f32.mrb[59].mxu1 }
 0x3de   : > { %v1658_v42 = vpop.f32.mrb[60].mxu1 }
 0x3df   : > { %v1660_v27 = vpop.f32.mrb[61].mxu1 }
 0x3e2   : > { %v1663_v17 = vpop.f32.mrb[62].mxu1 }
 0x3e3   : > { %v1665_v9 = vpop.f32.mrb[63].mxu1 }
 0x3e4   : > { %967 = vadd.xlane.f32.xlu0 %v2927_v53  ;;  %v2411_v53 = vpop.eup %2410 }
 0x3e5   : > { %v2413_v32 = vpop.eup %2412  ;;  %v1697_v33 = vmul.f32 %v2411_v53, %v1638_v16 }
 0x3e6   : > { %v1668_v1 = vpop.f32.mrb[64].mxu1  ;;  %v1699_v7 = vmul.f32 %v2413_v32, %v1648_v21 }
 0x3e7   : > { %v1670_v50 = vpop.f32.mrb[65].mxu1 }
 0x3ed   : > { %964 = vadd.xlane.f32.xlu1 %v2913_v24  ;;  %v2415_v24 = vpop.eup %2414 }
 0x3ee   : > { %v2417_v14 = vpop.eup %2416  ;;  %v1698_v15 = vmul.f32 %v2415_v24, %v1643_v58 }
 0x3ef   : > { %v1701_v56 = vmul.f32 %v2417_v14, %v1658_v42  ;;  %v2419_v57 = vpop.eup %2418 }
 0x3f0   : > { %v2421_v35 = vpop.eup %2420  ;;  %v1700_v60 = vmul.f32 %v2419_v57, %v1653_v44 }
 0x3f1   : > { %v1703_v61 = vmul.f32 %v2421_v35, %v1668_v1  ;;  %v2423_v52 = vpop.eup %2422 }
 0x3f2   : > { %v1702_v0 = vmul.f32 %v2423_v52, %v1663_v17 }
 0x3fa   : > { %1736 = vrot.lane.b32.xlu0 %v1696_v63, %s2471_s13 }
 0x3fe   : > { %1738 = vrot.lane.b32.xlu1 %v1697_v33, %s2471_s13  ;;  %1742 = vrot.lane.b32.xlu0 %v1699_v7, %s2471_s13  ;;  %v2428_v33 = vld [vmem:[%s2578_s25] sm:$0xf] }
 0x402   : > { %1746 = vrot.lane.b32.xlu0 %v1701_v56, %s2471_s13  ;;  %1740 = vrot.lane.b32.xlu1 %v1698_v15, %s2471_s13 }
 0x406   : > { %1750 = vrot.lane.b32.xlu0 %v1703_v61, %s2471_s13  ;;  %1744 = vrot.lane.b32.xlu1 %v1700_v60, %s2471_s13 }
 0x40a   : > { %1748 = vrot.lane.b32.xlu1 %v1702_v0, %s2471_s13 }
 0x40e   : > { %1928 = vperm.xlu1 %2234, %v1925_v18  }
 0x41f   : > { %v1721_v36 = vpop.permute.xlu0 %1720 }
 0x420   : > { %1769 = vst.msk [vmem:[#allocation2] sm:$0xff] %vm1768_vm2, %v1721_v36 }
 0x423   : > { %v1723_v2 = vpop.permute.xlu1 %1722 }
 0x424   : > { %1770 = vst.msk [vmem:[#allocation2 + $0x8] sm:$0xff] %vm1768_vm2, %v1723_v2 }
 0x427   : > { %v1725_v3 = vpop.permute.xlu0 %1724  ;;  %v1786_v20 = vld [vmem:[#allocation2] sm:$0xff] }
 0x428   : > { %1771 = vst.msk [vmem:[#allocation2 + $0x10] sm:$0xff] %vm1768_vm2, %v1725_v3 }
 0x42b   : > { %v1727_v4 = vpop.permute.xlu1 %1726  ;;  %v1787_v13 = vld [vmem:[#allocation2 + $0x8] sm:$0xff] }
 0x42c   : > { %1772 = vst.msk [vmem:[#allocation2 + $0x18] sm:$0xff] %vm1768_vm2, %v1727_v4  ;;  %v2157_v38 = vpack.c.bf16 %v1787_v13, %v1786_v20 }
 0x42e   : > { %2159 = vmatpush3.bf16.xpose.msk.msra.mxu0 %vm3019_vm5, %v2157_v38 }
 0x42f   : > { %v1729_v29 = vpop.permute.xlu0 %1728  ;;  %2160 = vmatprep.subr.bf16.mxu0 %v2472_v43  ;;  %v1788_v5 = vld [vmem:[#allocation2 + $0x10] sm:$0xff] }
 0x430   : > { %1773 = vst.msk [vmem:[#allocation2 + $0x20] sm:$0xff] %vm1768_vm2, %v1729_v29 }
 0x433   : > { %v1731_v39 = vpop.permute.xlu1 %1730  ;;  %v1789_v6 = vld [vmem:[#allocation2 + $0x18] sm:$0xff] }
 0x434   : > { %1774 = vst.msk [vmem:[#allocation2 + $0x28] sm:$0xff] %vm1768_vm2, %v1731_v39  ;;  %v2161_v19 = vpack.c.bf16 %v1789_v6, %v1788_v5 }
 0x436   : > { %2163 = vmatpush3.bf16.xpose.msk.msra.mxu0 %vm3019_vm5, %v2161_v19 }
 0x437   : > { %v1733_v34 = vpop.permute.xlu0 %1732  ;;  %2164 = vmatprep.subr.bf16.mxu0 %v2472_v43  ;;  %v1790_v22 = vld [vmem:[#allocation2 + $0x20] sm:$0xff] }
 0x438   : > { %1775 = vst.msk [vmem:[#allocation2 + $0x30] sm:$0xff] %vm1768_vm2, %v1733_v34 }
 0x43b   : > { %v1735_v28 = vpop.permute.xlu1 %1734  ;;  %v1791_v23 = vld [vmem:[#allocation2 + $0x28] sm:$0xff] }
 0x43c   : > { %1776 = vst.msk [vmem:[#allocation2 + $0x38] sm:$0xff] %vm1768_vm2, %v1735_v28  ;;  %v2165_v8 = vpack.c.bf16 %v1791_v23, %v1790_v22 }
 0x43e   : > { %2167 = vmatpush3.bf16.xpose.msk.msra.mxu0 %vm3019_vm5, %v2165_v8 }
 0x43f   : > { %2168 = vmatprep.subr.bf16.mxu0 %v2472_v43  ;;  %v1792_v31 = vld [vmem:[#allocation2 + $0x30] sm:$0xff] }
 0x443   : > { %v1793_v40 = vld [vmem:[#allocation2 + $0x38] sm:$0xff] }
 0x444   : > { %v2169_v59 = vpack.c.bf16 %v1793_v40, %v1792_v31 }
 0x446   : > { %2171 = vmatpush3.bf16.xpose.msk.msra.mxu0 %vm3019_vm5, %v2169_v59 }
 0x447   : > { %2172 = vmatprep.subr.bf16.mxu0 %v2472_v43 }
 0x471   : > { %v968_v16 = vpop.xlane.xlu0 %967 }
 0x472   : > { %2424 = vrcp.f32 %v968_v16 }
 0x475   : > { %v1737_v49 = vpop.permute.xlu0 %1736 }
 0x476   : > { %1777 = vst.msk [vmem:[#allocation2 + $0x40] sm:$0xff] %vm1768_vm2, %v1737_v49 }
 0x479   : > { %v1743_v58 = vpop.permute.xlu0 %1742 }
 0x47a   : > { %1780 = vst.msk [vmem:[#allocation2 + $0x58] sm:$0xff] %vm1768_vm2, %v1743_v58  ;;  %v965_v48 = vpop.xlane.xlu1 %964 }
 0x47b   : > { %2426 = vrcp.f32 %v965_v48 }
 0x47c   : > { %v2425_v21 = vpop.eup %2424 }
 0x47d   : > { %v1747_v47 = vpop.permute.xlu0 %1746  ;;  %v1145_v44 = vmul.f32 %v2425_v21, %v2989_v46  ;;  %v1794_v26 = vld [vmem:[#allocation2 + $0x40] sm:$0xff] }
 0x47e   : > { %1782 = vst.msk [vmem:[#allocation2 + $0x68] sm:$0xff] %vm1768_vm2, %v1747_v47  ;;  %v1739_v41 = vpop.permute.xlu1 %1738 }
 0x47f   : > { %1778 = vst.msk [vmem:[#allocation2 + $0x48] sm:$0xff] %vm1768_vm2, %v1739_v41 }
 0x480   : > { %1161 = vst.msk [vmem:[#allocation2 + $0x78] sm:$0xff] %vm368_vm1, %v1145_v44 }
 0x481   : > { %v1751_v42 = vpop.permute.xlu0 %1750  ;;  %v1797_v25 = vld [vmem:[#allocation2 + $0x58] sm:$0xff] }
 0x482   : > { %1784 = vst.msk [vmem:[#allocation2 + $0x78] sm:$0xff] %vm1768_vm2, %v1751_v42  ;;  %v1741_v27 = vpop.permute.xlu1 %1740 }
 0x483   : > { %1779 = vst.msk [vmem:[#allocation2 + $0x50] sm:$0xff] %vm1768_vm2, %v1741_v27 }
 0x485   : > { %v2427_v17 = vpop.eup %2426  ;;  %v1799_v11 = vld [vmem:[#allocation2 + $0x68] sm:$0xff] }
 0x486   : > { %v1745_v9 = vpop.permute.xlu1 %1744  ;;  %v1795_v1 = vld [vmem:[#allocation2 + $0x48] sm:$0xff]  ;;  %v1144_v50 = vmul.f32 %v2427_v17, %v2987_v51 }
 0x487   : > { %1781 = vst.msk [vmem:[#allocation2 + $0x60] sm:$0xff] %vm1768_vm2, %v1745_v9  ;;  %v2173_v46 = vpack.c.bf16 %v1795_v1, %v1794_v26 }
 0x488   : > { %1160 = vst.msk [vmem:[#allocation2 + $0x70] sm:$0xff] %vm368_vm1, %v1144_v50 }
 0x489   : > { %2175 = vmatpush3.bf16.xpose.msk.msra.mxu0 %vm3019_vm5, %v2173_v46  ;;  %v1801_v63 = vld [vmem:[#allocation2 + $0x78] sm:$0xff] }
 0x48a   : > { %v1749_v62 = vpop.permute.xlu1 %1748  ;;  %2176 = vmatprep.subr.bf16.mxu0 %v2472_v43  ;;  %v1796_v55 = vld [vmem:[#allocation2 + $0x50] sm:$0xff] }
 0x48b   : > { %1783 = vst.msk [vmem:[#allocation2 + $0x70] sm:$0xff] %vm1768_vm2, %v1749_v62  ;;  %v2177_v37 = vpack.c.bf16 %v1797_v25, %v1796_v55 }
 0x48e   : > { %v1798_v51 = vld [vmem:[#allocation2 + $0x60] sm:$0xff]  ;;  %v1929_v14 = vpop.permute.xlu1 %1928 }
 0x48f   : > { %v2181_v12 = vpack.c.bf16 %v1799_v11, %v1798_v51 }
 0x491   : > { %2179 = vmatpush3.bf16.xpose.msk.msra.mxu0 %vm3019_vm5, %v2177_v37 }
 0x492   : > { %2180 = vmatprep.subr.bf16.mxu0 %v2472_v43  ;;  %v1800_v45 = vld [vmem:[#allocation2 + $0x70] sm:$0xff] }
 0x493   : > { %v2185_v53 = vpack.c.bf16 %v1801_v63, %v1800_v45 }
 0x499   : > { %2183 = vmatpush3.bf16.xpose.msk.msra.mxu0 %vm3019_vm5, %v2181_v12 }
 0x49a   : > { %2184 = vmatprep.subr.bf16.mxu0 %v2472_v43 }
 0x4a1   : > { %2187 = vmatpush3.bf16.xpose.msk.msra.mxu0 %vm3019_vm5, %v2185_v53 }
 0x4a8   : > { %2154 = vmatmul.mubr.msk.f32.vlgmr.msra.gmra.mrb[66].mxu0 %vm1802_vm4, %v1785_v54 }
 0x57b   : > { %v1920_v32 = vpop.f32.mrb[66].mxu0 }
 0x57c   : > { %v1924_v7 = vadd.f32 %v2428_v33, %v1920_v32  ;;  %v2155_v24 = vpop.f32.mrb[67].mxu0 }
 0x57e   : > { %v1931_v43 = vadd.f32 %v1929_v14, %v1924_v7 }
 0x580   : > { %1932 = vst [vmem:[%s356_s20] sm:$0xf] %v1931_v43 }
 0x581 PF: > { %s18_s9 = sadd.s32 1, %s2467_s9   ;;  %s3155_s27 = smov %s2459_s29 }
 0x582   : > { %p15_p7 = scmp.ge.s32.totalorder %s18_s9, 6   ;;  %s3156_s28 = smov %s2463_s30 }
 0x583   : > { %s3157_s29 = smov %s3160_s10  ;;  %s3158_s30 = smov %s3164_s11 }
 0x584   :  { %17 = sbr.rel (!%p15_p7) target bundleno = 3 (0x3), region = 85 }

</bundles_post_ra>
